<compile_context>
chip_gen: v7x
topology: tpu7x:2x2x1
jax: 0.10.0
libtpu: 0.0.40
codegen_flags: <defaults>
</compile_context>

<pallas_src>
import math
from functools import partial

import jax
import jax.numpy as jnp
from jax import lax
from jax.experimental import pallas as pl
from jax.experimental.pallas import tpu as pltpu


def _attention_kernel(q_ref, k_ref, v_ref,
                      wq_ref, bq_ref, wk_ref, bk_ref,
                      wv_ref, bv_ref, wo_ref, bo_ref,
                      out_ref, weight_ref,
                      kp_ref, vp_ref, *, scale):
    # ---- K/V projections: once per batch element, cached in VMEM scratch ----
    @pl.when(pl.program_id(1) == 0)
    def _():
        k = k_ref[0]                                   # [T_src, kv_dim] bf16
        v = v_ref[0]                                   # [T_src, kv_dim] bf16
        kp = jnp.dot(k, wk_ref[...],
                     preferred_element_type=jnp.float32) + bk_ref[...]
        vp = jnp.dot(v, wv_ref[...],
                     preferred_element_type=jnp.float32) + bv_ref[...]
        kp_ref[...] = kp.astype(kp_ref.dtype)          # bf16 cache
        vp_ref[...] = vp.astype(vp_ref.dtype)          # bf16 cache

    # ---- Q projection for this T_tgt tile (fold the softmax scale in) ----
    q = q_ref[0]                                       # [tq, q_dim] bf16
    qp = jnp.dot(q, wq_ref[...],
                 preferred_element_type=jnp.float32) + bq_ref[...]
    qp = (qp * scale).astype(jnp.bfloat16)             # [tq, d_model]

    # ---- scores: contract last dims of qp and kp (no transpose) ----
    score = lax.dot_general(
        qp, kp_ref[...],
        dimension_numbers=(((1,), (1,)), ((), ())),
        preferred_element_type=jnp.float32)            # [tq, T_src] f32

    # ---- numerically stable softmax over T_src ----
    m = jnp.max(score, axis=-1, keepdims=True)
    e = jnp.exp(score - m)
    denom = jnp.sum(e, axis=-1, keepdims=True)
    weight = e * pl.reciprocal(denom, approx=True)     # [tq, T_src] f32

    # ---- weighted sum of values + output projection ----
    ctx = jnp.dot(weight.astype(jnp.bfloat16), vp_ref[...],
                  preferred_element_type=jnp.float32)  # [tq, d_model]
    out = jnp.dot(ctx.astype(jnp.bfloat16), wo_ref[...],
                  preferred_element_type=jnp.float32) + bo_ref[...]

    out_ref[0] = out.astype(out_ref.dtype)
    weight_ref[0] = weight.astype(weight_ref.dtype)


def _pick_tq(T_tgt):
    """Pick a T_tgt tile: big enough to amortize grid-step overhead, small
    enough that the [tq, T_src] softmax state + output blocks fit VMEM.
    v7x (64 MiB VMEM) gets a smaller tile than v5e/v6e (128 MiB)."""
    try:
        vmem_bytes = pltpu.get_tpu_info().vmem_capacity_bytes
    except Exception:
        vmem_bytes = 128 * 1024 * 1024
    pref = 256 if vmem_bytes >= 128 * 1024 * 1024 else 128
    if T_tgt <= pref:
        return T_tgt
    for t in (pref, 128, 64, 32, 16, 8):
        if T_tgt % t == 0:
            return t
    return T_tgt  # fallback: single full-extent tile


def attention_forward(q, k, v, params, *, tq=None):
    """q: [bs, T_tgt, q_dim], k/v: [bs, T_src, kv_dim]. Returns (out, weight)."""
    bs, T_tgt, q_dim = q.shape
    _, T_src, kv_dim = k.shape
    d_model = params["wq"].shape[1]
    scale = 1.0 / math.sqrt(kv_dim)   # matches d_k = k.size(-1) before k_proj

    if tq is None:
        tq = _pick_tq(T_tgt)
    n_tq = pl.cdiv(T_tgt, tq)

    # bf16 MXU operands (activations + weights); biases stay f32 and are added
    # to the f32-accumulated matmul results.
    bf = jnp.bfloat16
    qb, kb, vb = q.astype(bf), k.astype(bf), v.astype(bf)
    wq, wk = params["wq"].astype(bf), params["wk"].astype(bf)
    wv, wo = params["wv"].astype(bf), params["wo"].astype(bf)
    bq, bk = params["bq"], params["bk"]
    bv, bo = params["bv"], params["bo"]

    kernel = partial(_attention_kernel, scale=scale)
    full2d = lambda shape: pl.BlockSpec(shape, lambda b, j: (0, 0))

    grid_spec = pltpu.PrefetchScalarGridSpec(
        num_scalar_prefetch=0,
        grid=(bs, n_tq),
        in_specs=[
            pl.BlockSpec((1, tq, q_dim), lambda b, j: (b, j, 0)),     # q tile
            pl.BlockSpec((1, T_src, kv_dim), lambda b, j: (b, 0, 0)), # k (per batch)
            pl.BlockSpec((1, T_src, kv_dim), lambda b, j: (b, 0, 0)), # v (per batch)
            full2d((q_dim, d_model)),    # wq  (pre-transposed: [in, out])
            full2d((1, d_model)),        # bq
            full2d((kv_dim, d_model)),   # wk
            full2d((1, d_model)),        # bk
            full2d((kv_dim, d_model)),   # wv
            full2d((1, d_model)),        # bv
            full2d((d_model, d_model)),  # wo
            full2d((1, d_model)),        # bo
        ],
        out_specs=[
            pl.BlockSpec((1, tq, d_model), lambda b, j: (b, j, 0)),   # out
            pl.BlockSpec((1, tq, T_src), lambda b, j: (b, j, 0)),     # weight
        ],
        scratch_shapes=[
            pltpu.VMEM((T_src, d_model), jnp.bfloat16),   # kp cache
            pltpu.VMEM((T_src, d_model), jnp.bfloat16),   # vp cache
        ],
    )

    out, weight = pl.pallas_call(
        kernel,
        out_shape=(
            jax.ShapeDtypeStruct((bs, T_tgt, d_model), jnp.float32),
            jax.ShapeDtypeStruct((bs, T_tgt, T_src), jnp.float32),
        ),
        grid_spec=grid_spec,
        compiler_params=pltpu.CompilerParams(
            # batch axis parallel (megacore / v7x 2nd core); the T_tgt-tile
            # axis must stay "arbitrary" because it reuses kp/vp scratch
            # written at tile 0.
            dimension_semantics=("parallel", "arbitrary"),
            vmem_limit_bytes=64 * 1024 * 1024,
        ),
    )(qb, kb, vb, wq, bq, wk, bk, wv, bv, wo, bo)
    return out, weight


def init_params(key, kv_dim, q_dim, d_model):
    """Deterministic synthetic params. Weights stored as [in_dim, out_dim]
    (i.e. PyTorch nn.Linear weight transposed)."""
    ks = jax.random.split(key, 8)
    def lin(kw, kb_, fan_in, fan_out):
        bound = 1.0 / math.sqrt(fan_in)
        w = jax.random.uniform(kw, (fan_in, fan_out), jnp.float32, -bound, bound)
        b = jax.random.uniform(kb_, (1, fan_out), jnp.float32, -bound, bound)
        return w, b
    wq, bq = lin(ks[0], ks[1], q_dim, d_model)
    wk, bk = lin(ks[2], ks[3], kv_dim, d_model)
    wv, bv = lin(ks[4], ks[5], kv_dim, d_model)
    wo, bo = lin(ks[6], ks[7], d_model, d_model)
    return dict(wq=wq, bq=bq, wk=wk, bk=bk, wv=wv, bv=bv, wo=wo, bo=bo)


def attention_ref(q, k, v, params):
    """Pure-JAX f32 reference mirroring the PyTorch forward (weight=None path)."""
    d_k = k.shape[-1]
    qp = q @ params["wq"] + params["bq"][0]
    kp = k @ params["wk"] + params["bk"][0]
    vp = v @ params["wv"] + params["bv"][0]
    score = jnp.einsum("btd,bsd->bts", qp, kp) / math.sqrt(d_k)
    weight = jax.nn.softmax(score, axis=-1)
    out = jnp.einsum("bts,bsd->btd", weight, vp) @ params["wo"] + params["bo"][0]
    return out, weight


if __name__ == "__main__":
    key = jax.random.PRNGKey(0)
    k_params, k_q, k_k, k_v = jax.random.split(key, 4)

    # Small but TPU-friendly: output last dims (d_model=128, T_src=128) are
    # lane-dense; T_tgt=512 exercises the T_tgt tiling + kp/vp scratch reuse.
    bs, T_tgt, T_src = 2, 512, 128
    q_dim, kv_dim, d_model = 64, 64, 128

    params = init_params(k_params, kv_dim, q_dim, d_model)
    q = jax.random.normal(k_q, (bs, T_tgt, q_dim), jnp.float32)
    k = jax.random.normal(k_k, (bs, T_src, kv_dim), jnp.float32)
    v = jax.random.normal(k_v, (bs, T_src, kv_dim), jnp.float32)

    out, weight = attention_forward(q, k, v, params)
    jax.block_until_ready((out, weight))

    out_ref, weight_ref = attention_ref(q, k, v, params)
    assert out.shape == (bs, T_tgt, d_model)
    assert weight.shape == (bs, T_tgt, T_src)
    # Tolerances loosened for bf16 MXU operands + approx reciprocal
    # (still tight enough to catch structural / scale / transpose bugs).
    assert jnp.allclose(out, out_ref, atol=2e-2, rtol=5e-2), (
        f"max|d_out|={float(jnp.max(jnp.abs(out - out_ref)))}")
    assert jnp.allclose(weight, weight_ref, atol=1e-2, rtol=5e-2), (
        f"max|d_weight|={float(jnp.max(jnp.abs(weight - weight_ref)))}")

    print("KERNEL_OK")
</pallas_src>

<mosaic_0001>
module attributes {stable_mosaic.version = 11 : i64} {
  func.func @_attention_kernel(%arg0: i32, %arg1: i32, %arg2: memref<1x256x64xbf16, #tpu.memory_space<vmem>>, %arg3: memref<1x128x64xbf16, #tpu.memory_space<vmem>>, %arg4: memref<1x128x64xbf16, #tpu.memory_space<vmem>>, %arg5: memref<64x128xbf16, #tpu.memory_space<vmem>>, %arg6: memref<1x128xf32, #tpu.memory_space<vmem>>, %arg7: memref<64x128xbf16, #tpu.memory_space<vmem>>, %arg8: memref<1x128xf32, #tpu.memory_space<vmem>>, %arg9: memref<64x128xbf16, #tpu.memory_space<vmem>>, %arg10: memref<1x128xf32, #tpu.memory_space<vmem>>, %arg11: memref<128x128xbf16, #tpu.memory_space<vmem>>, %arg12: memref<1x128xf32, #tpu.memory_space<vmem>>, %arg13: memref<1x256x128xf32, #tpu.memory_space<vmem>>, %arg14: memref<1x256x128xf32, #tpu.memory_space<vmem>>, %arg15: memref<128x128xbf16, #tpu.memory_space<vmem>>, %arg16: memref<128x128xbf16, #tpu.memory_space<vmem>>) attributes {dimension_semantics = [#tpu.dimension_semantics<parallel>, #tpu.dimension_semantics<arbitrary>], iteration_bounds = array<i64: 2, 2>, scalar_prefetch = 0 : i64, scratch_operands = 2 : i64, tpu.core_type = #tpu.core_type<tc>, window_params = [{transform_indices = @transform_0, window_bounds = array<i64: 1, 256, 64>}, {transform_indices = @transform_1, window_bounds = array<i64: 1, 128, 64>}, {transform_indices = @transform_2, window_bounds = array<i64: 1, 128, 64>}, {pipeline_mode = #tpu.pipeline_mode<synchronous>, transform_indices = @transform_3, window_bounds = array<i64: 64, 128>}, {pipeline_mode = #tpu.pipeline_mode<synchronous>, transform_indices = @transform_4, window_bounds = array<i64: 1, 128>}, {pipeline_mode = #tpu.pipeline_mode<synchronous>, transform_indices = @transform_5, window_bounds = array<i64: 64, 128>}, {pipeline_mode = #tpu.pipeline_mode<synchronous>, transform_indices = @transform_6, window_bounds = array<i64: 1, 128>}, {pipeline_mode = #tpu.pipeline_mode<synchronous>, transform_indices = @transform_7, window_bounds = array<i64: 64, 128>}, {pipeline_mode = #tpu.pipeline_mode<synchronous>, transform_indices = @transform_8, window_bounds = array<i64: 1, 128>}, {pipeline_mode = #tpu.pipeline_mode<synchronous>, transform_indices = @transform_9, window_bounds = array<i64: 128, 128>}, {pipeline_mode = #tpu.pipeline_mode<synchronous>, transform_indices = @transform_10, window_bounds = array<i64: 1, 128>}, {transform_indices = @transform_11, window_bounds = array<i64: 1, 256, 128>}, {transform_indices = @transform_12, window_bounds = array<i64: 1, 256, 128>}]} {
    %c0_i32 = arith.constant 0 : i32
    %0 = arith.cmpi eq, %arg1, %c0_i32 : i32
    %1 = arith.extui %0 : i1 to i32
    %c0_i32_0 = arith.constant 0 : i32
    %2 = arith.cmpi ne, %1, %c0_i32_0 : i32
    scf.if %2 {
      %c0_27 = arith.constant 0 : index
      %c0_28 = arith.constant 0 : index
      %c0_29 = arith.constant 0 : index
      %40 = vector.load %arg3[%c0_27, %c0_28, %c0_29] : memref<1x128x64xbf16, #tpu.memory_space<vmem>>, vector<1x128x64xbf16>
      %41 = vector.shape_cast %40 : vector<1x128x64xbf16> to vector<128x64xbf16>
      %c0_30 = arith.constant 0 : index
      %c0_31 = arith.constant 0 : index
      %c0_32 = arith.constant 0 : index
      %42 = vector.load %arg4[%c0_30, %c0_31, %c0_32] : memref<1x128x64xbf16, #tpu.memory_space<vmem>>, vector<1x128x64xbf16>
      %43 = vector.shape_cast %42 : vector<1x128x64xbf16> to vector<128x64xbf16>
      %c0_33 = arith.constant 0 : index
      %c0_34 = arith.constant 0 : index
      %44 = vector.load %arg7[%c0_33, %c0_34] : memref<64x128xbf16, #tpu.memory_space<vmem>>, vector<64x128xbf16>
      %cst_35 = arith.constant dense<0.000000e+00> : vector<128x128xf32>
      %45 = tpu.matmul %41, %44, %cst_35 {dimension_numbers = #tpu.dot_dimension_numbers<[1], [0], [0], [1], [0, 0, 1, 1], [], []>} : vector<128x64xbf16>, vector<64x128xbf16>, vector<128x128xf32> -> vector<128x128xf32>
      %c0_36 = arith.constant 0 : index
      %c0_37 = arith.constant 0 : index
      %46 = vector.load %arg8[%c0_36, %c0_37] : memref<1x128xf32, #tpu.memory_space<vmem>>, vector<1x128xf32>
      %47 = vector.broadcast %46 : vector<1x128xf32> to vector<128x128xf32>
      %48 = arith.addf %45, %47 : vector<128x128xf32>
      %c0_38 = arith.constant 0 : index
      %c0_39 = arith.constant 0 : index
      %49 = vector.load %arg9[%c0_38, %c0_39] : memref<64x128xbf16, #tpu.memory_space<vmem>>, vector<64x128xbf16>
      %cst_40 = arith.constant dense<0.000000e+00> : vector<128x128xf32>
      %50 = tpu.matmul %43, %49, %cst_40 {dimension_numbers = #tpu.dot_dimension_numbers<[1], [0], [0], [1], [0, 0, 1, 1], [], []>} : vector<128x64xbf16>, vector<64x128xbf16>, vector<128x128xf32> -> vector<128x128xf32>
      %c0_41 = arith.constant 0 : index
      %c0_42 = arith.constant 0 : index
      %51 = vector.load %arg10[%c0_41, %c0_42] : memref<1x128xf32, #tpu.memory_space<vmem>>, vector<1x128xf32>
      %52 = vector.broadcast %51 : vector<1x128xf32> to vector<128x128xf32>
      %53 = arith.addf %50, %52 : vector<128x128xf32>
      %54 = arith.truncf %48 : vector<128x128xf32> to vector<128x128xbf16>
      %c0_43 = arith.constant 0 : index
      %c0_44 = arith.constant 0 : index
      %55 = vector.load %arg15[%c0_43, %c0_44] : memref<128x128xbf16, #tpu.memory_space<vmem>>, vector<128x128xbf16>
      tpu.vector_store %arg15[%c0_43, %c0_44], %54 {strides = array<i32>} : memref<128x128xbf16, #tpu.memory_space<vmem>>, vector<128x128xbf16>,
      %56 = arith.truncf %53 : vector<128x128xf32> to vector<128x128xbf16>
      %c0_45 = arith.constant 0 : index
      %c0_46 = arith.constant 0 : index
      %57 = vector.load %arg16[%c0_45, %c0_46] : memref<128x128xbf16, #tpu.memory_space<vmem>>, vector<128x128xbf16>
      tpu.vector_store %arg16[%c0_45, %c0_46], %56 {strides = array<i32>} : memref<128x128xbf16, #tpu.memory_space<vmem>>, vector<128x128xbf16>,
    } else {
    }
    %c0 = arith.constant 0 : index
    %c0_1 = arith.constant 0 : index
    %c0_2 = arith.constant 0 : index
    %3 = vector.load %arg2[%c0, %c0_1, %c0_2] : memref<1x256x64xbf16, #tpu.memory_space<vmem>>, vector<1x256x64xbf16>
    %4 = vector.shape_cast %3 : vector<1x256x64xbf16> to vector<256x64xbf16>
    %c0_3 = arith.constant 0 : index
    %c0_4 = arith.constant 0 : index
    %5 = vector.load %arg5[%c0_3, %c0_4] : memref<64x128xbf16, #tpu.memory_space<vmem>>, vector<64x128xbf16>
    %cst = arith.constant dense<0.000000e+00> : vector<256x128xf32>
    %6 = tpu.matmul %4, %5, %cst {dimension_numbers = #tpu.dot_dimension_numbers<[1], [0], [0], [1], [0, 0, 1, 1], [], []>} : vector<256x64xbf16>, vector<64x128xbf16>, vector<256x128xf32> -> vector<256x128xf32>
    %c0_5 = arith.constant 0 : index
    %c0_6 = arith.constant 0 : index
    %7 = vector.load %arg6[%c0_5, %c0_6] : memref<1x128xf32, #tpu.memory_space<vmem>>, vector<1x128xf32>
    %8 = vector.broadcast %7 : vector<1x128xf32> to vector<256x128xf32>
    %9 = arith.addf %6, %8 : vector<256x128xf32>
    %cst_7 = arith.constant 1.250000e-01 : f32
    %10 = vector.broadcast %cst_7 : f32 to vector<256x128xf32>
    %11 = arith.mulf %9, %10 : vector<256x128xf32>
    %12 = arith.truncf %11 : vector<256x128xf32> to vector<256x128xbf16>
    %c0_8 = arith.constant 0 : index
    %c0_9 = arith.constant 0 : index
    %13 = vector.load %arg15[%c0_8, %c0_9] : memref<128x128xbf16, #tpu.memory_space<vmem>>, vector<128x128xbf16>
    %cst_10 = arith.constant dense<0.000000e+00> : vector<256x128xf32>
    %14 = tpu.matmul %12, %13, %cst_10 {dimension_numbers = #tpu.dot_dimension_numbers<[1], [1], [0], [0], [0, 0, 1, 0], [], []>} : vector<256x128xbf16>, vector<128x128xbf16>, vector<256x128xf32> -> vector<256x128xf32>
    %cst_11 = arith.constant dense<0xFF800000> : vector<256xf32>
    %15 = vector.multi_reduction <maximumf>, %14, %cst_11 [1] : vector<256x128xf32> to vector<256xf32>
    %16 = vector.shape_cast %15 : vector<256xf32> to vector<256x1xf32>
    %17 = vector.broadcast %16 : vector<256x1xf32> to vector<256x128xf32>
    %18 = arith.subf %14, %17 : vector<256x128xf32>
    %19 = math.exp %18 : vector<256x128xf32>
    %cst_12 = arith.constant dense<0.000000e+00> : vector<256xf32>
    %20 = vector.multi_reduction <add>, %19, %cst_12 [1] : vector<256x128xf32> to vector<256xf32>
    %21 = vector.shape_cast %20 : vector<256xf32> to vector<256x1xf32>
    %22 = tpu.reciprocal %21 {approx = true} : vector<256x1xf32> -> vector<256x1xf32>
    %23 = vector.broadcast %22 : vector<256x1xf32> to vector<256x128xf32>
    %24 = arith.mulf %19, %23 : vector<256x128xf32>
    %25 = arith.truncf %24 : vector<256x128xf32> to vector<256x128xbf16>
    %c0_13 = arith.constant 0 : index
    %c0_14 = arith.constant 0 : index
    %26 = vector.load %arg16[%c0_13, %c0_14] : memref<128x128xbf16, #tpu.memory_space<vmem>>, vector<128x128xbf16>
    %cst_15 = arith.constant dense<0.000000e+00> : vector<256x128xf32>
    %27 = tpu.matmul %25, %26, %cst_15 {dimension_numbers = #tpu.dot_dimension_numbers<[1], [0], [0], [1], [0, 0, 1, 1], [], []>} : vector<256x128xbf16>, vector<128x128xbf16>, vector<256x128xf32> -> vector<256x128xf32>
    %28 = arith.truncf %27 : vector<256x128xf32> to vector<256x128xbf16>
    %c0_16 = arith.constant 0 : index
    %c0_17 = arith.constant 0 : index
    %29 = vector.load %arg11[%c0_16, %c0_17] : memref<128x128xbf16, #tpu.memory_space<vmem>>, vector<128x128xbf16>
    %cst_18 = arith.constant dense<0.000000e+00> : vector<256x128xf32>
    %30 = tpu.matmul %28, %29, %cst_18 {dimension_numbers = #tpu.dot_dimension_numbers<[1], [0], [0], [1], [0, 0, 1, 1], [], []>} : vector<256x128xbf16>, vector<128x128xbf16>, vector<256x128xf32> -> vector<256x128xf32>
    %c0_19 = arith.constant 0 : index
    %c0_20 = arith.constant 0 : index
    %31 = vector.load %arg12[%c0_19, %c0_20] : memref<1x128xf32, #tpu.memory_space<vmem>>, vector<1x128xf32>
    %32 = vector.broadcast %31 : vector<1x128xf32> to vector<256x128xf32>
    %33 = arith.addf %30, %32 : vector<256x128xf32>
    %c0_21 = arith.constant 0 : index
    %c0_22 = arith.constant 0 : index
    %c0_23 = arith.constant 0 : index
    %34 = vector.load %arg13[%c0_21, %c0_22, %c0_23] : memref<1x256x128xf32, #tpu.memory_space<vmem>>, vector<1x256x128xf32>
    %35 = vector.shape_cast %34 : vector<1x256x128xf32> to vector<256x128xf32>
    %36 = vector.shape_cast %33 : vector<256x128xf32> to vector<1x256x128xf32>
    tpu.vector_store %arg13[%c0_21, %c0_22, %c0_23], %36 {strides = array<i32>} : memref<1x256x128xf32, #tpu.memory_space<vmem>>, vector<1x256x128xf32>,
    %c0_24 = arith.constant 0 : index
    %c0_25 = arith.constant 0 : index
    %c0_26 = arith.constant 0 : index
    %37 = vector.load %arg14[%c0_24, %c0_25, %c0_26] : memref<1x256x128xf32, #tpu.memory_space<vmem>>, vector<1x256x128xf32>
    %38 = vector.shape_cast %37 : vector<1x256x128xf32> to vector<256x128xf32>
    %39 = vector.shape_cast %24 : vector<256x128xf32> to vector<1x256x128xf32>
    tpu.vector_store %arg14[%c0_24, %c0_25, %c0_26], %39 {strides = array<i32>} : memref<1x256x128xf32, #tpu.memory_space<vmem>>, vector<1x256x128xf32>,
    return
  }
  func.func @transform_0(%arg0: i32, %arg1: i32) -> (i32, i32, i32) {
    %c0_i32 = arith.constant 0 : i32
    %c0_i32_0 = arith.constant 0 : i32
    return %arg0, %arg1, %c0_i32 : i32, i32, i32
  }
  func.func @transform_1(%arg0: i32, %arg1: i32) -> (i32, i32, i32) {
    %c0_i32 = arith.constant 0 : i32
    %c0_i32_0 = arith.constant 0 : i32
    %c0_i32_1 = arith.constant 0 : i32
    return %arg0, %c0_i32, %c0_i32_0 : i32, i32, i32
  }
  func.func @transform_2(%arg0: i32, %arg1: i32) -> (i32, i32, i32) {
    %c0_i32 = arith.constant 0 : i32
    %c0_i32_0 = arith.constant 0 : i32
    %c0_i32_1 = arith.constant 0 : i32
    return %arg0, %c0_i32, %c0_i32_0 : i32, i32, i32
  }
  func.func @transform_3(%arg0: i32, %arg1: i32) -> (i32, i32) {
    %c0_i32 = arith.constant 0 : i32
    %c0_i32_0 = arith.constant 0 : i32
    %c0_i32_1 = arith.constant 0 : i32
    return %c0_i32, %c0_i32_0 : i32, i32
  }
  func.func @transform_4(%arg0: i32, %arg1: i32) -> (i32, i32) {
    %c0_i32 = arith.constant 0 : i32
    %c0_i32_0 = arith.constant 0 : i32
    %c0_i32_1 = arith.constant 0 : i32
    return %c0_i32, %c0_i32_0 : i32, i32
  }
  func.func @transform_5(%arg0: i32, %arg1: i32) -> (i32, i32) {
    %c0_i32 = arith.constant 0 : i32
    %c0_i32_0 = arith.constant 0 : i32
    %c0_i32_1 = arith.constant 0 : i32
    return %c0_i32, %c0_i32_0 : i32, i32
  }
  func.func @transform_6(%arg0: i32, %arg1: i32) -> (i32, i32) {
    %c0_i32 = arith.constant 0 : i32
    %c0_i32_0 = arith.constant 0 : i32
    %c0_i32_1 = arith.constant 0 : i32
    return %c0_i32, %c0_i32_0 : i32, i32
  }
  func.func @transform_7(%arg0: i32, %arg1: i32) -> (i32, i32) {
    %c0_i32 = arith.constant 0 : i32
    %c0_i32_0 = arith.constant 0 : i32
    %c0_i32_1 = arith.constant 0 : i32
    return %c0_i32, %c0_i32_0 : i32, i32
  }
  func.func @transform_8(%arg0: i32, %arg1: i32) -> (i32, i32) {
    %c0_i32 = arith.constant 0 : i32
    %c0_i32_0 = arith.constant 0 : i32
    %c0_i32_1 = arith.constant 0 : i32
    return %c0_i32, %c0_i32_0 : i32, i32
  }
  func.func @transform_9(%arg0: i32, %arg1: i32) -> (i32, i32) {
    %c0_i32 = arith.constant 0 : i32
    %c0_i32_0 = arith.constant 0 : i32
    %c0_i32_1 = arith.constant 0 : i32
    return %c0_i32, %c0_i32_0 : i32, i32
  }
  func.func @transform_10(%arg0: i32, %arg1: i32) -> (i32, i32) {
    %c0_i32 = arith.constant 0 : i32
    %c0_i32_0 = arith.constant 0 : i32
    %c0_i32_1 = arith.constant 0 : i32
    return %c0_i32, %c0_i32_0 : i32, i32
  }
  func.func @transform_11(%arg0: i32, %arg1: i32) -> (i32, i32, i32) {
    %c0_i32 = arith.constant 0 : i32
    %c0_i32_0 = arith.constant 0 : i32
    return %arg0, %arg1, %c0_i32 : i32, i32, i32
  }
  func.func @transform_12(%arg0: i32, %arg1: i32) -> (i32, i32, i32) {
    %c0_i32 = arith.constant 0 : i32
    %c0_i32_0 = arith.constant 0 : i32
    return %arg0, %arg1, %c0_i32 : i32, i32, i32
  }
}

</mosaic_0001>

<bundles_post_ra>
// kernel: tpu_custom_call.1
= control target key start
LH: loop header
LB: loop body
LE: loop exit
PB: predicated region body
PF: predicated region fallthrough
CT: control target
= control target key end

     0   :  { %s5369_s0 = inlined_call_operand.hbm [shape: bf16[2,512,64], index: 0, kind: input, shape index: {}]   ;;  %s5370_s1 = inlined_call_operand.hbm [shape: bf16[2,128,64], index: 1, kind: input, shape index: {}]   ;;  %s5371_s2 = inlined_call_operand.hbm [shape: bf16[2,128,64], index: 2, kind: input, shape index: {}]   ;;  %s5372_s3 = inlined_call_operand.hbm [shape: bf16[64,128], index: 3, kind: input, shape index: {}]   ;;  %s5373_s4 = inlined_call_operand.hbm [shape: f32[1,128], index: 4, kind: input, shape index: {}]   ;;  %s5374_s5 = inlined_call_operand.hbm [shape: bf16[64,128], index: 5, kind: input, shape index: {}]   ;;  %s5375_s6 = inlined_call_operand.hbm [shape: f32[1,128], index: 6, kind: input, shape index: {}]   ;;  %s5376_s7 = inlined_call_operand.hbm [shape: bf16[64,128], index: 7, kind: input, shape index: {}]   ;;  %s5377_s8 = inlined_call_operand.hbm [shape: f32[1,128], index: 8, kind: input, shape index: {}]   ;;  %s5378_s9 = inlined_call_operand.hbm [shape: bf16[128,128], index: 9, kind: input, shape index: {}]   ;;  %s5379_s10 = inlined_call_operand.hbm [shape: f32[1,128], index: 10, kind: input, shape index: {}]   ;;  %s5380_s11 = inlined_call_operand.hbm [shape: f32[2,512,128], index: 11, kind: output, shape index: {0}]   ;;  %s5381_s12 = inlined_call_operand.hbm [shape: f32[2,512,128], index: 12, kind: output, shape index: {1}]  }
   0x1   :  { %5411 = sst [smem:[#allocation43_spill]] %s5369_s0 }
   0x2   :  { %5412 = sst [smem:[#allocation44_spill]] %s5370_s1 }
   0x3   :  { %5413 = sst [smem:[#allocation45_spill]] %s5372_s3 }
   0x4   :  { %5414 = sst [smem:[#allocation46_spill]] %s5373_s4 }
   0x5   :  { %5415 = sst [smem:[#allocation47_spill]] %s5374_s5 }
   0x6   :  { %5416 = sst [smem:[#allocation48_spill]] %s5375_s6 }
   0x7   :  { %5417 = sst [smem:[#allocation49_spill]] %s5376_s7 }
   0x8   :  { %5418 = sst [smem:[#allocation50_spill]] %s5377_s8 }
   0x9   :  { %5419 = sst [smem:[#allocation51_spill]] %s5378_s9 }
   0xa   :  { %5420 = sst [smem:[#allocation52_spill]] %s5379_s10 }
   0xb   :  { %5421 = sst [smem:[#allocation53_spill]] %s5380_s11 }
   0xc   :  { %5422 = sst [smem:[#allocation54_spill]] %s5381_s12 }
   0xd   :  { %18 = vsyncpa [#allocation5], 0 }
   0xe   :  { %20 = vsyncpa [#allocation5 + $0x1], 0 }
   0xf   :  { %21 = vsyncpa [#allocation8], 0 }
  0x10   :  { %23 = vsyncpa [#allocation8 + $0x1], 0 }
  0x11   :  { %24 = vsyncpa [#allocation11], 0 }
  0x12   :  { %25 = vsyncpa [#allocation14], 0 }
  0x13   :  { %26 = vsyncpa [#allocation17], 0 }
  0x14   :  { %27 = vsyncpa [#allocation20], 0 }
  0x15   :  { %28 = vsyncpa [#allocation6], 0 }
  0x16   :  { %30 = vsyncpa [#allocation6 + $0x1], 0 }
  0x17   :  { %31 = vsyncpa [#allocation24], 0 }
  0x18   :  { %33 = vsyncpa [#allocation24 + $0x1], 0  ;;  %s4222_s21 = smov 0   ;;  %s4224_s22 = smov 0  }
  0x19   :  { %s4226_s23 = smov 0   ;;  %s4228_s24 = smov 0  }
  0x1a   :  { %s4230_s25 = smov 0   ;;  %s4232_s26 = smov 0  }
  0x1b   :  { %s4234_s27 = smov 0   ;;  %s4236_s28 = smov 0  }
  0x1c   :  { %s4238_s29 = smov 0   ;;  %s4240_s30 = smov 0  }
  0x1d   :  { %s4242_s13 = smov 0  }
  0x1e LB: > { %5423 = sst [smem:[#allocation33_spill]] %s4102_s22  ;;  %s4278_s14 = sadd.s32 4294967295, %s4138_s13   ;;  %s4138_s13 = sphi %s4242_s13, %s39_s13   ;;  %s4134_s30 = sphi %s4240_s30, %s5503_s30   ;;  %s4130_s29 = sphi %s4238_s29, %s5498_s29   ;;  %s4126_s28 = sphi %s4236_s28, %s5502_s28   ;;  %s4122_s27 = sphi %s4234_s27, %s5497_s27   ;;  %s4118_s26 = sphi %s4232_s26, %s5501_s26   ;;  %s4114_s25 = sphi %s4230_s25, %s5495_s25   ;;  %s4110_s24 = sphi %s4228_s24, %s5494_s24   ;;  %s4106_s23 = sphi %s4226_s23, %s5500_s23   ;;  %s4102_s22 = sphi %s4224_s22, %s5499_s22   ;;  %s4098_s21 = sphi %s4222_s21, %s5493_s21  }
  0x1f   : > { %5424 = sst [smem:[#allocation34_spill]] %s4110_s24  ;;  %p2769_p0 = scmp.ge.s32.totalorder %s4138_s13, 1 }
  0x20   : > { %5425 = sst [smem:[#allocation35_spill]] %s4114_s25  ;;  %p5390_p1 = scmp.eq.s32.totalorder %s4278_s14, 0 }
  0x21   : > { %5426 = sst [smem:[#allocation36_spill]] %s4118_s26  ;;  %p360_p2 = scmp.lt.s32.totalorder %s4138_s13, 5 }
  0x22   : > { %5427 = sst [smem:[#allocation37_spill]] %s4122_s27  ;;  %s4140_s16 = smov [#allocation10]  }
  0x23   : > { %5428 = sst [smem:[#allocation38_spill]] %s4126_s28  ;;  %p4283_p3 = pnand %p2769_p0, %p360_p2 }
  0x24   : > { %5429 = sst [smem:[#allocation39_spill]] %s4130_s29  ;;  %s372_s17 = sshll.u32 %s4140_s16, 4  ;;  %s4287_s17 = int_to_ptr.vmem [resolvable:$true] %s372_s17 }
  0x25   : > { %s5430_s15 = scalar_select %p4283_p3, 1, 0 }
  0x26   : > { %p3310_p4 = pneg %p4283_p3  ;;  %s4141_s19 = smov [#allocation13]  }
  0x27   : > { %5431 = sst [smem:[#allocation40_spill]] %s5430_s15  ;;  %s396_s20 = sshll.u32 %s4141_s19, 4  ;;  %s4297_s20 = int_to_ptr.vmem [resolvable:$true] %s396_s20 }
  0x28   : > { %p4293_p5 = pnand %p3310_p4, %p5390_p1  ;;  %s4142_s11 = smov [#allocation16]  }
  0x29   : > { %s4299_s12 = sshll.u32 %s4142_s11, 4  ;;  %s5433_s3 = sld [smem:[#allocation45_spill]]  ;;  %s421_s12 = int_to_ptr.vmem [resolvable:$true] %s4299_s12 }
  0x2a   : > { %s5432_s18 = scalar_select %p4293_p5, 1, 0 }
  0x2b   : > { %p4309_p7 = pneg %p4293_p5 }
  0x2f   : > { %s3650_s16 = scalar_lea.hbm %s5433_s3, 512 }
  0x30   : > { %p3651_p6 = scmp.ne.s32.totalorder %s5433_s3, %s3650_s16  ;;  %p3657_p10 = scmp.lt.u32.totalorder %s3650_s16, %s5433_s3 }
  0x32   : > { %p3653_p8 = pnand %p4309_p7, %p3651_p6 }
  0x34   : > { %p3654_p9 = pneg %p3653_p8 }
  0x36   : > { %p3659_p11 = pnand %p3657_p10, %p3654_p9 }
  0x38   : > { %3662 = shalt.err (!%p3659_p11)
}
  0x39   : > { %s3663_s0 = scalar_lea.vmem %s4287_s17, 512  ;;  %p3671_p2 = scmp.lt.s32.totalorder %s4287_s17, %s4287_s17 }
  0x3a   : > { %p3664_p12 = scmp.ne.s32.totalorder %s4287_s17, %s3663_s0  ;;  %p3672_p4 = scmp.lt.s32.totalorder %s3663_s0, %s3663_s0 }
  0x3c   : > { %p3666_p13 = pnand %p3664_p12, %p4309_p7  ;;  %p3673_p6 = por %p3672_p4, %p3671_p2 }
  0x3e   : > { %p3667_p0 = pneg %p3666_p13 }
  0x40   : > { %p3674_p8 = pnand %p3673_p6, %p3667_p0 }
  0x42   : > { %3677 = shalt.err (!%p3674_p8)
}
  0x43   : > { %s5393_s27 = smov 64   ;;  %s5406_s28 = smov 4  }
  0x44   : > { %3313 = dma.hbm_to_vmem [thread:$0]  (!%p4293_p5), %s5433_s3, 512, %s4287_s17, [#allocation11], %s5393_s27, %s5393_s27, %s5406_s28  }
  0x45   : > { %s5435_s5 = sld [smem:[#allocation47_spill]] }
  0x4b   : > { %s3678_s0 = scalar_lea.hbm %s5435_s5, 512 }
  0x4c   : > { %p3679_p9 = scmp.ne.s32.totalorder %s5435_s5, %s3678_s0  ;;  %p3685_p12 = scmp.lt.u32.totalorder %s3678_s0, %s5435_s5 }
  0x4e   : > { %p3681_p10 = pnand %p3679_p9, %p4309_p7 }
  0x50   : > { %p3682_p11 = pneg %p3681_p10 }
  0x52   : > { %p3687_p13 = pnand %p3685_p12, %p3682_p11 }
  0x54   : > { %3690 = shalt.err (!%p3687_p13)
}
  0x55   : > { %s3691_s17 = scalar_lea.vmem %s4297_s20, 512  ;;  %p3699_p6 = scmp.lt.s32.totalorder %s4297_s20, %s4297_s20 }
  0x56   : > { %p3692_p0 = scmp.ne.s32.totalorder %s4297_s20, %s3691_s17  ;;  %p3700_p8 = scmp.lt.s32.totalorder %s3691_s17, %s3691_s17 }
  0x58   : > { %p3694_p2 = pnand %p3692_p0, %p4309_p7  ;;  %p3701_p9 = por %p3700_p8, %p3699_p6 }
  0x5a   : > { %p3695_p4 = pneg %p3694_p2 }
  0x5c   : > { %p3702_p10 = pnand %p3701_p9, %p3695_p4 }
  0x5e   : > { %3705 = shalt.err (!%p3702_p10)
}
  0x5f   : > { %3319 = dma.hbm_to_vmem [thread:$0]  (!%p4293_p5), %s5435_s5, 512, %s4297_s20, [#allocation14], %s5393_s27, %s5393_s27, %s5406_s28  }
  0x60   : > { %s5436_s7 = sld [smem:[#allocation49_spill]] }
  0x66   : > { %s3706_s15 = scalar_lea.hbm %s5436_s7, 512 }
  0x67   : > { %p3707_p11 = scmp.ne.s32.totalorder %s5436_s7, %s3706_s15  ;;  %p3713_p0 = scmp.lt.u32.totalorder %s3706_s15, %s5436_s7 }
  0x69   : > { %p3709_p12 = pnand %p3707_p11, %p4309_p7 }
  0x6b   : > { %p3710_p13 = pneg %p3709_p12 }
  0x6d   : > { %p3715_p2 = pnand %p3713_p0, %p3710_p13 }
  0x6f   : > { %3718 = shalt.err (!%p3715_p2)
}
  0x70   : > { %s3719_s17 = scalar_lea.vmem %s421_s12, 512  ;;  %p3727_p9 = scmp.lt.s32.totalorder %s421_s12, %s421_s12 }
  0x71   : > { %p3720_p4 = scmp.ne.s32.totalorder %s421_s12, %s3719_s17  ;;  %p3728_p10 = scmp.lt.s32.totalorder %s3719_s17, %s3719_s17 }
  0x73   : > { %p3722_p6 = pnand %p3720_p4, %p4309_p7  ;;  %p3729_p1 = por %p3728_p10, %p3727_p9 }
  0x75   : > { %p3723_p8 = pneg %p3722_p6 }
  0x77   : > { %p3730_p3 = pnand %p3729_p1, %p3723_p8 }
  0x79   : > { %3733 = shalt.err (!%p3730_p3)
}
  0x7a   : > { %3325 = dma.hbm_to_vmem [thread:$0]  (!%p4293_p5), %s5436_s7, 512, %s421_s12, [#allocation17], %s5393_s27, %s5393_s27, %s5406_s28  }
  0x7b   : > { %s4145_s25 = smov [#allocation19]   ;;  %s5437_s9 = sld [smem:[#allocation51_spill]] }
  0x7c   : > { %s444_s26 = sshll.u32 %s4145_s25, 4  ;;  %s445_s26 = int_to_ptr.vmem [resolvable:$true] %s444_s26 }
  0x81   : > { %s3734_s16 = scalar_lea.hbm %s5437_s9, 1024 }
  0x82   : > { %p3735_p1 = scmp.ne.s32.totalorder %s5437_s9, %s3734_s16  ;;  %p3741_p12 = scmp.lt.u32.totalorder %s3734_s16, %s5437_s9 }
  0x84   : > { %p3737_p3 = pnand %p3735_p1, %p4309_p7 }
  0x86   : > { %p3738_p11 = pneg %p3737_p3 }
  0x88   : > { %p3743_p13 = pnand %p3741_p12, %p3738_p11 }
  0x8a   : > { %3746 = shalt.err (!%p3743_p13)
}
  0x8b   : > { %s3747_s12 = scalar_lea.vmem %s445_s26, 1024  ;;  %p3755_p6 = scmp.lt.s32.totalorder %s445_s26, %s445_s26 }
  0x8c   : > { %p3748_p0 = scmp.ne.s32.totalorder %s445_s26, %s3747_s12  ;;  %p3756_p8 = scmp.lt.s32.totalorder %s3747_s12, %s3747_s12 }
  0x8e   : > { %p3750_p2 = pnand %p3748_p0, %p4309_p7  ;;  %p3757_p9 = por %p3756_p8, %p3755_p6 }
  0x90   : > { %p3751_p4 = pneg %p3750_p2 }
  0x92   : > { %p3758_p10 = pnand %p3757_p9, %p3751_p4 }
  0x94   : > { %3761 = shalt.err (!%p3758_p10)
}
  0x95   : > { %3331 = dma.hbm_to_vmem [thread:$0]  (!%p4293_p5), %s5437_s9, 1024, %s445_s26, [#allocation20], %s5393_s27, %s5393_s27, %s5406_s28  }
  0x96   : > { %p5396_p1 = scmp.eq.s32.totalorder %s4138_s13, 0  ;;  %p93_p3 = scmp.ne.s32.totalorder %s4106_s23, %s4102_s22 }
  0x97   : > { %p99_p11 = scmp.ne.s32.totalorder %s4102_s22, %s4098_s21  ;;  %p5395_p12 = scmp.lt.s32.totalorder %s4138_s13, 4 }
  0x98   : > { %p95_p13 = por %p93_p3, %p5396_p1  ;;  %s492_s29 = sand.u32 1, %s4138_s13  }
  0x99   : > { %p5438_p0 = scmp.eq.s32.totalorder %s4278_s14, 0  ;;  %s494_s16 = sand.u32 1, %s4106_s23  }
  0x9a   : > { %s5392_s19 = sshll.u32 %s4134_s30, 10  ;;  %s4420_s11 = sshll.u32 %s494_s16, 6 }
  0x9b   : > { %p4414_p2 = por %p99_p11, %p5438_p0  ;;  %s5441_s1 = sld [smem:[#allocation44_spill]] }
  0x9c   : > { %p4431_p4 = pnand %p5395_p12, %p95_p13  ;;  %s496_s12 = scalar_lea.vmem [#allocation7], %s4420_s11 }
  0x9d   : > { %s5439_s15 = scalar_select %p4414_p2, 1, 0 }
  0x9e   : > { %s5442_s21 = scalar_select %p4431_p4, 1, 0 }
  0x9f   : > { %5440 = sst [smem:[#allocation41_spill]] %s5439_s15  ;;  %s503_s20 = sshll.u32 %s496_s12, 4  ;;  %s4436_s20 = int_to_ptr.vmem [resolvable:$true] %s503_s20 }
  0xa0   : > { %s4438_s10 = scalar_lea.sflag [#allocation8], %s492_s29  ;;  %p5403_p8 = pneg %p4431_p4 }
  0xa1   : > { %s4427_s17 = scalar_lea.hbm %s5441_s1, %s5392_s19  ;;  %s3767_s25 = scalar_lea.hbm %s5441_s1, 2048 }
  0xa2   : > { %s3762_s16 = scalar_lea.hbm %s4427_s17, 1024  ;;  %p3768_p3 = scmp.lt.u32.totalorder %s4427_s17, %s5441_s1 }
  0xa3   : > { %p3763_p6 = scmp.ne.s32.totalorder %s4427_s17, %s3762_s16  ;;  %p3769_p11 = scmp.lt.u32.totalorder %s3767_s25, %s3762_s16 }
  0xa4   : > { %p3771_p0 = scmp.lt.u32.totalorder %s3762_s16, %s4427_s17 }
  0xa5   : > { %p3765_p9 = pnand %p5403_p8, %p3763_p6  ;;  %p3770_p13 = por %p3769_p11, %p3768_p3 }
  0xa7   : > { %p3766_p10 = pneg %p3765_p9  ;;  %p3772_p12 = por %p3771_p0, %p3770_p13 }
  0xa9   : > { %p3773_p1 = pnand %p3772_p12, %p3766_p10 }
  0xab   : > { %3776 = shalt.err (!%p3773_p1)
}
  0xac   : > { %s3777_s29 = scalar_lea.vmem %s4436_s20, 1024  ;;  %s4146_s12 = smov [#allocation7]  }
  0xad   : > { %p3778_p6 = scmp.ne.s32.totalorder %s4436_s20, %s3777_s29  ;;  %s3782_s0 = sshll.u32 %s4146_s12, 4  ;;  %s3783_s0 = int_to_ptr.vmem [resolvable:$false] %s3782_s0 }
  0xae   : > { %s3784_s27 = scalar_lea.vmem %s3783_s0, 2048  ;;  %p3785_p5 = scmp.lt.s32.totalorder %s4436_s20, %s3783_s0 }
  0xaf   : > { %p3780_p9 = pnand %p3778_p6, %p5403_p8  ;;  %p3786_p3 = scmp.lt.s32.totalorder %s3784_s27, %s3777_s29 }
  0xb1   : > { %p3781_p2 = pneg %p3780_p9  ;;  %p3787_p11 = por %p3786_p3, %p3785_p5 }
  0xb3   : > { %p3788_p13 = pnand %p3787_p11, %p3781_p2 }
  0xb5   : > { %3791 = shalt.err (!%p3788_p13)
}
  0xb6   : > { %s5443_s25 = smov 64   ;;  %s86_s19 = sadd.s32 1, %s4106_s23 }
  0xb7   : > { %3341 = dma.hbm_to_vmem [thread:$0]  (!%p4431_p4), %s4427_s17, 1024, %s4436_s20, %s4438_s10, %s5443_s25, %s5443_s25, %s5406_s28  }
  0xb8   : > { %s5444_s16 = sshll.u32 %s4134_s30, 10  ;;  %s517_s0 = scalar_lea.vmem [#allocation9], %s4420_s11 }
  0xb9   : > { %s4475_s12 = scalar_lea.hbm %s5371_s2, %s5444_s16  ;;  %s4478_s27 = sshll.u32 %s517_s0, 4  ;;  %s4613_s27 = int_to_ptr.vmem [resolvable:$true] %s4478_s27 }
  0xba   : > { %s4147_s1 = smov [#allocation12]   ;;  %s4148_s5 = smov [#allocation15]  }
  0xbb   : > { %s386_s3 = sshll.u32 %s4147_s1, 4  ;;  %s410_s7 = sshll.u32 %s4148_s5, 4  ;;  %s387_s3 = int_to_ptr.vmem [resolvable:$true] %s386_s3  ;;  %s411_s7 = int_to_ptr.vmem [resolvable:$true] %s410_s7 }
  0xbc   : > { %s5445_s4 = sld [smem:[#allocation46_spill]] }
  0xc2   : > { %s3792_s22 = scalar_lea.hbm %s5445_s4, 16 }
  0xc3   : > { %p3793_p5 = scmp.ne.s32.totalorder %s5445_s4, %s3792_s22  ;;  %p3799_p2 = scmp.lt.u32.totalorder %s3792_s22, %s5445_s4 }
  0xc5   : > { %p3795_p1 = pnand %p3793_p5, %p4309_p7 }
  0xc7   : > { %p3796_p12 = pneg %p3795_p1 }
  0xc9   : > { %p3801_p10 = pnand %p3799_p2, %p3796_p12 }
  0xcb   : > { %3804 = shalt.err (!%p3801_p10)
}
  0xcc   : > { %s3805_s1 = scalar_lea.vmem %s387_s3, 16  ;;  %s3812_s5 = scalar_lea.vmem %s387_s3, 32 }
  0xcd   : > { %p3806_p0 = scmp.ne.s32.totalorder %s387_s3, %s3805_s1  ;;  %p3813_p3 = scmp.lt.s32.totalorder %s387_s3, %s387_s3 }
  0xce   : > { %p3814_p11 = scmp.lt.s32.totalorder %s3812_s5, %s3805_s1 }
  0xcf   : > { %p3808_p6 = pnand %p3806_p0, %p4309_p7 }
  0xd0   : > { %p3815_p13 = por %p3814_p11, %p3813_p3 }
  0xd1   : > { %p3809_p9 = pneg %p3808_p6 }
  0xd3   : > { %p3816_p8 = pnand %p3815_p13, %p3809_p9 }
  0xd5   : > { %3819 = shalt.err (!%p3816_p8)
}
  0xd6   : > { %p5446_p5 = scmp.ne.s32.totalorder %s5432_s18, 0  ;;  %s5447_s6 = sld [smem:[#allocation48_spill]] }
  0xd8   : > { %3316 = dma.hbm_to_vmem [thread:$0]  (!%p5446_p5), %s5445_s4, 16, %s387_s3, [#allocation11]  }
  0xdc   : > { %s3820_s29 = scalar_lea.hbm %s5447_s6, 16 }
  0xdd   : > { %p3821_p1 = scmp.ne.s32.totalorder %s5447_s6, %s3820_s29  ;;  %p3827_p8 = scmp.lt.u32.totalorder %s3820_s29, %s5447_s6 }
  0xdf   : > { %p3823_p12 = pnand %p3821_p1, %p4309_p7 }
  0xe1   : > { %p3824_p2 = pneg %p3823_p12 }
  0xe3   : > { %p3829_p10 = pnand %p3827_p8, %p3824_p2 }
  0xe5   : > { %3832 = shalt.err (!%p3829_p10)
}
  0xe6   : > { %s3833_s11 = scalar_lea.vmem %s411_s7, 16  ;;  %s3840_s3 = scalar_lea.vmem %s411_s7, 32 }
  0xe7   : > { %p3834_p0 = scmp.ne.s32.totalorder %s411_s7, %s3833_s11  ;;  %p3841_p3 = scmp.lt.s32.totalorder %s411_s7, %s411_s7 }
  0xe8   : > { %p3842_p11 = scmp.lt.s32.totalorder %s3840_s3, %s3833_s11 }
  0xe9   : > { %p3836_p6 = pnand %p3834_p0, %p4309_p7 }
  0xea   : > { %p3843_p13 = por %p3842_p11, %p3841_p3 }
  0xeb   : > { %p3837_p9 = pneg %p3836_p6 }
  0xed   : > { %p3844_p4 = pnand %p3843_p13, %p3837_p9 }
  0xef   : > { %3847 = shalt.err (!%p3844_p4)
}
  0xf0   : > { %3322 = dma.hbm_to_vmem [thread:$0]  (!%p5446_p5), %s5447_s6, 16, %s411_s7, [#allocation14]  }
  0xf1   : > { %s4149_s9 = smov [#allocation18]   ;;  %s4150_s22 = smov [#allocation21]  }
  0xf2   : > { %s434_s15 = sshll.u32 %s4149_s9, 4  ;;  %s458_s26 = sshll.u32 %s4150_s22, 4  ;;  %s435_s15 = int_to_ptr.vmem [resolvable:$true] %s434_s15  ;;  %s459_s26 = int_to_ptr.vmem [resolvable:$true] %s458_s26 }
  0xf3   : > { %s5448_s8 = sld [smem:[#allocation50_spill]] }
  0xf9   : > { %s3848_s17 = scalar_lea.hbm %s5448_s8, 16 }
  0xfa   : > { %p3849_p4 = scmp.ne.s32.totalorder %s5448_s8, %s3848_s17  ;;  %p3855_p2 = scmp.lt.u32.totalorder %s3848_s17, %s5448_s8 }
  0xfc   : > { %p3851_p1 = pnand %p3849_p4, %p4309_p7 }
  0xfe   : > { %p3852_p12 = pneg %p3851_p1 }
 0x100   : > { %p3857_p8 = pnand %p3855_p2, %p3852_p12 }
 0x102   : > { %3860 = shalt.err (!%p3857_p8)
}
 0x103   : > { %s3861_s7 = scalar_lea.vmem %s435_s15, 16  ;;  %s3868_s1 = scalar_lea.vmem %s435_s15, 32 }
 0x104   : > { %p3862_p10 = scmp.ne.s32.totalorder %s435_s15, %s3861_s7  ;;  %p3869_p9 = scmp.lt.s32.totalorder %s435_s15, %s435_s15 }
 0x105   : > { %p3870_p3 = scmp.lt.s32.totalorder %s3868_s1, %s3861_s7 }
 0x106   : > { %p3864_p0 = pnand %p3862_p10, %p4309_p7 }
 0x107   : > { %p3871_p11 = por %p3870_p3, %p3869_p9 }
 0x108   : > { %p3865_p6 = pneg %p3864_p0 }
 0x10a   : > { %p3872_p13 = pnand %p3871_p11, %p3865_p6 }
 0x10c   : > { %3875 = shalt.err (!%p3872_p13)
}
 0x10d   : > { %3328 = dma.hbm_to_vmem [thread:$0]  (!%p5446_p5), %s5448_s8, 16, %s435_s15, [#allocation17]  }
 0x10e   : > { %s5449_s0 = sld [smem:[#allocation52_spill]] }
 0x114   : > { %s3876_s17 = scalar_lea.hbm %s5449_s0, 16 }
 0x115   : > { %p3877_p4 = scmp.ne.s32.totalorder %s5449_s0, %s3876_s17  ;;  %p3883_p2 = scmp.lt.u32.totalorder %s3876_s17, %s5449_s0 }
 0x117   : > { %p3879_p1 = pnand %p3877_p4, %p4309_p7 }
 0x119   : > { %p3880_p12 = pneg %p3879_p1 }
 0x11b   : > { %p3885_p8 = pnand %p3883_p2, %p3880_p12 }
 0x11d   : > { %3888 = shalt.err (!%p3885_p8)
}
 0x11e   : > { %s3889_s7 = scalar_lea.vmem %s459_s26, 16  ;;  %s3896_s15 = scalar_lea.vmem %s459_s26, 32 }
 0x11f   : > { %p3890_p10 = scmp.ne.s32.totalorder %s459_s26, %s3889_s7  ;;  %p3897_p9 = scmp.lt.s32.totalorder %s459_s26, %s459_s26 }
 0x120   : > { %p3898_p3 = scmp.lt.s32.totalorder %s3896_s15, %s3889_s7 }
 0x121   : > { %p3892_p0 = pnand %p3890_p10, %p4309_p7 }
 0x122   : > { %p3899_p11 = por %p3898_p3, %p3897_p9 }
 0x123   : > { %p3893_p6 = pneg %p3892_p0 }
 0x125   : > { %p3900_p13 = pnand %p3899_p11, %p3893_p6 }
 0x127   : > { %3903 = shalt.err (!%p3900_p13)
}
 0x128   : > { %s5450_s9 = sld [smem:[#allocation39_spill]]  ;;  %s5451_s22 = sld [smem:[#allocation36_spill]] }
 0x129   : > { %s5452_s29 = sld [smem:[#allocation35_spill]]  ;;  %s5453_s17 = sld [smem:[#allocation34_spill]] }
 0x12a   : > { %3334 = dma.hbm_to_vmem [thread:$0]  (!%p5446_p5), %s5449_s0, 16, %s459_s26, [#allocation20]  }
 0x12b   : > { %s2768_s24 = sadd.s32 4294967294, %s4138_s13   ;;  %p319_p12 = scmp.eq.s32.totalorder %s4278_s14, 3 }
 0x12c   : > { %s5455_s16 = sadd.s32 1, %s4134_s30  ;;  %p5456_p2 = scmp.eq.s32.totalorder %s4138_s13, 0 }
 0x12d   : > { %p5458_p10 = scmp.eq.s32.totalorder %s4278_s14, 0  ;;  %p325_p9 = scmp.eq.s32.totalorder %s2768_s24, 3 }
 0x12e   : > { %s48_s20 = sadd.s32 1, %s5450_s9  ;;  %s60_s18 = sadd.s32 1, %s5451_s22 }
 0x12f   : > { %p49_p7 = scmp.ge.s32.totalorder %s48_s20, 2  ;;  %p67_p4 = scmp.ne.s32.totalorder %s5451_s22, %s5452_s29 }
 0x130   : > { %p73_p1 = scmp.ne.s32.totalorder %s5452_s29, %s5453_s17  ;;  %s469_s1 = sand.u32 1, %s5451_s22  }
 0x131   : > { %s5505_s20 = smov (%p49_p7, %s48_s20), 0  ;;  %s5507_s16 = smov (!%p49_p7, %s5455_s16), %s4134_s30 }
 0x132   : > { %5454 = sst [smem:[#allocation42_spill]] %s5505_s20  ;;  %s56_s11 = ssub.s32 %s5450_s9, %s5505_s20 }
 0x133   : > { %p4569_p5 = por %p5456_p2, %p67_p4  ;;  %p53_p8 = scmp.ge.s32.totalorder %s5507_s16, 2 }
 0x134   : > { %p4575_p0 = por %p5458_p10, %p73_p1  ;;  %p4579_p6 = por %p319_p12, %p67_p4 }
 0x135   : > { %s5509_s16 = smov (%p53_p8, %s5507_s16), 0  ;;  %p4585_p3 = por %p325_p9, %p73_p1 }
 0x136   : > { %s5460_s7 = scalar_select %p4579_p6, 1, 0 }
 0x137   : > { %s5461_s15 = scalar_select %p4585_p3, 1, 0 }
 0x138   : > { %s55_s5 = ssub.s32 %s4134_s30, %s5509_s16  ;;  %s2779_s17 = sshll.u32 %s469_s1, 7 }
 0x139   : > { %s57_s29 = sor.u32 %s56_s11, %s55_s5  ;;  %p84_p11 = scmp.eq.s32.totalorder %s55_s5, 0 }
 0x13a   : > { %p58_p13 = scmp.eq.s32.totalorder %s57_s29, 0  ;;  %s2780_s24 = sshll.u32 %s5450_s9, 5 }
 0x13b   : > { %s4595_s28 = scalar_select %p84_p11, %s4106_s23, %s86_s19  }
 0x13c   : > { %s5511_s22 = smov (!%p58_p13, %s5451_s22), %s60_s18  ;;  %s2781_s0 = sshll.u32 %s4134_s30, 6 }
 0x13d   : > { %s473_s4 = scalar_lea.vmem [#allocation4], %s2779_s17  ;;  %s479_s8 = sadd.s32 %s2781_s0, %s2780_s24 }
 0x13e   : > { %s482_s6 = sshll.u32 %s473_s4, 4  ;;  %s2782_s20 = sshll.u32 %s479_s8, 6  ;;  %s4602_s6 = int_to_ptr.vmem [resolvable:$true] %s482_s6 }
 0x13f   : > { %p5462_p7 = scmp.lt.s32.totalorder %s4138_s13, 4  ;;  %s5464_s9 = sld [smem:[#allocation43_spill]] }
 0x140   : > { %s4620_s4 = scalar_lea.sflag [#allocation5], %s469_s1 }
 0x141   : > { %p4608_p4 = pnand %p5462_p7, %p4569_p5 }
 0x143   : > { %p3906_p12 = pneg %p4608_p4 }
 0x145   : > { %s4618_s5 = scalar_lea.hbm %s5464_s9, %s2782_s20  ;;  %s3909_s29 = scalar_lea.hbm %s5464_s9, 8192 }
 0x146   : > { %s3904_s8 = scalar_lea.hbm %s4618_s5, 2048  ;;  %p3910_p8 = scmp.lt.u32.totalorder %s4618_s5, %s5464_s9 }
 0x147   : > { %p3905_p1 = scmp.ne.s32.totalorder %s4618_s5, %s3904_s8  ;;  %p3911_p10 = scmp.lt.u32.totalorder %s3909_s29, %s3904_s8 }
 0x148   : > { %p3913_p11 = scmp.lt.u32.totalorder %s3904_s8, %s4618_s5 }
 0x149   : > { %p3907_p2 = pnand %p3906_p12, %p3905_p1  ;;  %p3912_p9 = por %p3911_p10, %p3910_p8 }
 0x14b   : > { %p3908_p5 = pneg %p3907_p2  ;;  %p3914_p13 = por %p3913_p11, %p3912_p9 }
 0x14d   : > { %p3915_p7 = pnand %p3914_p13, %p3908_p5 }
 0x14f   : > { %3918 = shalt.err (!%p3915_p7)
}
 0x150   : > { %s3919_s1 = scalar_lea.vmem %s4602_s6, 2048  ;;  %s4151_s24 = smov [#allocation4]  }
 0x151   : > { %p3920_p1 = scmp.ne.s32.totalorder %s4602_s6, %s3919_s1  ;;  %s3924_s19 = sshll.u32 %s4151_s24, 4  ;;  %s3925_s19 = int_to_ptr.vmem [resolvable:$false] %s3924_s19 }
 0x152   : > { %s3926_s18 = scalar_lea.vmem %s3925_s19, 4096  ;;  %p3927_p6 = scmp.lt.s32.totalorder %s4602_s6, %s3925_s19 }
 0x153   : > { %p3922_p2 = pnand %p3920_p1, %p3906_p12  ;;  %p3928_p8 = scmp.lt.s32.totalorder %s3926_s18, %s3919_s1 }
 0x155   : > { %p3923_p3 = pneg %p3922_p2  ;;  %p3929_p10 = por %p3928_p8, %p3927_p6 }
 0x157   : > { %p3930_p9 = pnand %p3929_p10, %p3923_p3 }
 0x159   : > { %3933 = shalt.err (!%p3930_p9)
}
 0x15a   : > { %s5465_s8 = smov 4   ;;  %s3934_s0 = scalar_lea.hbm %s4475_s12, 1024 }
 0x15b   : > { %3338 = dma.hbm_to_vmem [thread:$0]  (!%p4608_p4), %s4618_s5, 2048, %s4602_s6, %s4620_s4, %s5443_s25, %s5443_s25, %s5465_s8  }
 0x15c   : > { %p3935_p12 = scmp.ne.s32.totalorder %s4475_s12, %s3934_s0  ;;  %p5466_p5 = scmp.ne.s32.totalorder %s5442_s21, 0 }
 0x15d   : > { %s3939_s29 = scalar_lea.hbm %s5371_s2, 2048  ;;  %p3940_p13 = scmp.lt.u32.totalorder %s4475_s12, %s5371_s2 }
 0x15e   : > { %p5467_p6 = pneg %p5466_p5  ;;  %p3941_p7 = scmp.lt.u32.totalorder %s3939_s29, %s3934_s0 }
 0x15f   : > { %p3943_p2 = scmp.lt.u32.totalorder %s3934_s0, %s4475_s12 }
 0x160   : > { %p3937_p3 = pnand %p3935_p12, %p5467_p6  ;;  %p3942_p1 = por %p3941_p7, %p3940_p13 }
 0x162   : > { %p3938_p11 = pneg %p3937_p3  ;;  %p3944_p8 = por %p3943_p2, %p3942_p1 }
 0x164   : > { %p3945_p10 = pnand %p3944_p8, %p3938_p11 }
 0x166   : > { %3948 = shalt.err (!%p3945_p10)
}
 0x167   : > { %s3949_s6 = scalar_lea.vmem %s4613_s27, 1024  ;;  %p5468_p9 = pmov %p5467_p6 }
 0x168   : > { %p3950_p4 = scmp.ne.s32.totalorder %s4613_s27, %s3949_s6  ;;  %s4152_s5 = smov [#allocation9]  }
 0x169   : > { %s3954_s4 = sshll.u32 %s4152_s5, 4  ;;  %s3955_s4 = int_to_ptr.vmem [resolvable:$false] %s3954_s4 }
 0x16a   : > { %p3952_p12 = pnand %p3950_p4, %p5468_p9  ;;  %s3956_s1 = scalar_lea.vmem %s3955_s4, 2048 }
 0x16b   : > { %p3957_p3 = scmp.lt.s32.totalorder %s4613_s27, %s3955_s4  ;;  %p3958_p13 = scmp.lt.s32.totalorder %s3956_s1, %s3949_s6 }
 0x16c   : > { %p3953_p6 = pneg %p3952_p12 }
 0x16d   : > { %p3959_p7 = por %p3958_p13, %p3957_p3 }
 0x16f   : > { %p3960_p1 = pnand %p3959_p7, %p3953_p6 }
 0x171   : > { %3963 = shalt.err (!%p3960_p1)
}
 0x172   : > { %3344 = dma.hbm_to_vmem [thread:$0]  (!%p5466_p5), %s4475_s12, 1024, %s4613_s27, %s4438_s10, %s5443_s25, %s5443_s25, %s5465_s8  }
 0x173   : > { %s5469_s24 = sld [smem:[#allocation40_spill]] }
 0x179   : > { %p5470_p11 = scmp.ne.s32.totalorder %s5469_s24, 0 }
 0x17a   : > { %s5471_s19 = sld [smem:[#allocation35_spill]] (!%p5470_p11) }
 0x17b   : > { %536 = sbr.rel (%p5470_p11) target bundleno = 1960 (0x7a8), region = 64 }
 0x180   : > { %s4681_s18 = sand.u32 (!%p5470_p11), 1, %s5471_s19  }
 0x181   : > { %s2790_s0 = sshll.u32 (!%p5470_p11), %s4681_s18, 7  ;;  %s539_s26 = scalar_lea.sflag (!%p5470_p11), [#allocation5], %s4681_s18 }
 0x182   : > { %s4685_s11 = scalar_lea.vmem [#allocation4], %s2790_s0 }
 0x183   : > { %4065 = dma.done.wait (%p4575_p0), %s539_s26, 2048  }
 0x184   : > { %4067 = vsyncadd (%p4575_p0), %s539_s26, 4294965248  ;;  %s5472_s21 = sld [smem:[#allocation33_spill]]  ;;  %s5473_s10 = sld [smem:[#allocation41_spill]] }
 0x185   : > { %s547_s25 = sand.u32 1, %s4278_s14  }
 0x186   : > { %s548_s8 = scalar_lea.sflag [#allocation8], %s547_s25 }
 0x18a   : > { %s549_s12 = sand.u32 1, %s5472_s21   ;;  %p5474_p5 = scmp.ne.s32.totalorder %s5473_s10, 0 }
 0x18b   : > { %s2791_s27 = sshll.u32 %s549_s12, 6 }
 0x18c   : > { %s4693_s29 = scalar_lea.vmem [#allocation7], %s2791_s27 }
 0x18d   : > { %4069 = dma.done.wait (%p5474_p5), %s548_s8, 2048  }
 0x18e   : > { %4071 = vsyncadd (%p5474_p5), %s548_s8, 4294965248  ;;  %s4699_s20 = scalar_lea.vmem [#allocation9], %s2791_s27  ;;  %p5475_p2 = scmp.eq.s32.totalorder %s4278_s14, 0 }
 0x190   : > { %4073 = dma.done.wait (%p5475_p2), [#allocation11], 528   ;;  %p5476_p0 = pmov %p5475_p2 }
 0x192   : > { %4075 = vsyncadd (%p5476_p0), [#allocation11], 4294966768  ;;  %p5477_p8 = pmov %p5476_p0 }
 0x193   : > { %p5478_p10 = pmov %p5476_p0 }
 0x194   : > { %4077 = dma.done.wait (%p5477_p8), [#allocation14], 528  }
 0x195   : > { %4079 = vsyncadd (%p5478_p10), [#allocation14], 4294966768  ;;  %p5479_p4 = pmov %p5476_p0 }
 0x196   : > { %p5480_p9 = pmov %p5476_p0 }
 0x197   : > { %4081 = dma.done.wait (%p5479_p4), [#allocation17], 528  }
 0x198   : > { %4083 = vsyncadd (%p5480_p9), [#allocation17], 4294966768  ;;  %p5481_p12 = pmov %p5476_p0 }
 0x199   : > { %p5482_p6 = pmov %p5476_p0 }
 0x19a   : > { %4085 = dma.done.wait (%p5481_p12), [#allocation20], 1040  }
 0x19b   : > { %4087 = vsyncadd (%p5482_p6), [#allocation20], 4294966256  ;;  %s2801_s3 = sshll.u32 %s4681_s18, 8  ;;  %s5483_s5 = sld [smem:[#allocation37_spill]] }
 0x19c   : > { %s4718_s17 = scalar_lea.vmem [#allocation22], %s2801_s3  ;;  %s4720_s6 = scalar_lea.vmem [#allocation23], %s2801_s3 }
 0x1a1   : > { %p2803_p3 = scmp.ne.s32.totalorder %s5483_s5, 0 }
 0x1a2   : > { %v3470_v0 = vld [vmem:[#allocation13] sm:$0xff] (!%p2803_p3)   ;;  %v3472_v2 = vld [vmem:[#allocation13 + $0x8] sm:$0xff] (!%p2803_p3)   ;;  %v3474_v4 = vld [vmem:[#allocation13 + $0x10] sm:$0xff] (!%p2803_p3)   ;;  %vm767_vm0 = vcmask (!%p2803_p3), 523264  }
 0x1a3   : > { %655 = sbr.rel (%p2803_p3) target bundleno = 680 (0x2a8), region = 112  ;;  %v3471_v1 = vld [vmem:[#allocation16] sm:$0xff] (!%p2803_p3)   ;;  %3020 = vmatprep.subr.bf16.mxu0 (!%p2803_p3), %v3470_v0  ;;  %v3473_v3 = vld [vmem:[#allocation16 + $0x8] sm:$0xff] (!%p2803_p3)   ;;  %v3475_v5 = vld [vmem:[#allocation16 + $0x10] sm:$0xff] (!%p2803_p3)  }
 0x1a4   : > { %3044 = vmatprep.subr.bf16.mxu1 (!%p2803_p3), %v3471_v1  ;;  %3021 = vmatpush3.bf16.msra.mxu0 (!%p2803_p3), %v3470_v0  ;;  %v3476_v6 = vld [vmem:[#allocation13 + $0x18] sm:$0xff] (!%p2803_p3)   ;;  %v3480_v10 = vld [vmem:[%s4693_s29 + $0x8] sm:$0xff] (!%p2803_p3)   ;;  %v3482_v12 = vld [vmem:[%s4693_s29 + $0x10] sm:$0xff] (!%p2803_p3)  }
 0x1a5   : > { %3045 = vmatpush3.bf16.msra.mxu1 (!%p2803_p3), %v3471_v1  ;;  %3022 = vmatprep.subr.bf16.mxu0 (!%p2803_p3), %v3472_v2  ;;  %v3477_v7 = vld [vmem:[#allocation16 + $0x18] sm:$0xff] (!%p2803_p3)   ;;  %v3481_v11 = vld [vmem:[%s4699_s20 + $0x8] sm:$0xff] (!%p2803_p3)   ;;  %v3483_v13 = vld [vmem:[%s4699_s20 + $0x10] sm:$0xff] (!%p2803_p3)  }
 0x1a6   : > { %3046 = vmatprep.subr.bf16.mxu1 (!%p2803_p3), %v3473_v3  ;;  %v3478_v8 = vld [vmem:[%s4693_s29] sm:$0xff] (!%p2803_p3)   ;;  %v3484_v14 = vld [vmem:[%s4693_s29 + $0x18] sm:$0xff] (!%p2803_p3)   ;;  %v3488_v18 = vld [vmem:[%s4693_s29 + $0x28] sm:$0xff] (!%p2803_p3)  }
 0x1a7   : > { %v3479_v9 = vld [vmem:[%s4699_s20] sm:$0xff] (!%p2803_p3)   ;;  %3028 = vmatprep.mubr.msk.bf16.mxu0 (!%p2803_p3), %vm767_vm0, %v3478_v8  ;;  %v3485_v15 = vld [vmem:[%s4699_s20 + $0x18] sm:$0xff] (!%p2803_p3)   ;;  %v3489_v19 = vld [vmem:[%s4699_s20 + $0x28] sm:$0xff] (!%p2803_p3)  }
 0x1a8   : > { %3023 = vmatpush3.bf16.msra.mxu0 (!%p2803_p3), %v3472_v2  ;;  %3052 = vmatprep.mubr.msk.bf16.mxu1 (!%p2803_p3), %vm767_vm0, %v3479_v9  ;;  %v3486_v16 = vld [vmem:[%s4693_s29 + $0x20] sm:$0xff] (!%p2803_p3)   ;;  %v3490_v20 = vld [vmem:[%s4693_s29 + $0x30] sm:$0xff] (!%p2803_p3)   ;;  %v3492_v22 = vld [vmem:[%s4693_s29 + $0x38] sm:$0xff] (!%p2803_p3)  }
 0x1a9   : > { %3047 = vmatpush3.bf16.msra.mxu1 (!%p2803_p3), %v3473_v3  ;;  %3024 = vmatprep.subr.bf16.mxu0 (!%p2803_p3), %v3474_v4  ;;  %v3487_v17 = vld [vmem:[%s4699_s20 + $0x20] sm:$0xff] (!%p2803_p3)   ;;  %v3491_v21 = vld [vmem:[%s4699_s20 + $0x30] sm:$0xff] (!%p2803_p3)   ;;  %v3493_v23 = vld [vmem:[%s4699_s20 + $0x38] sm:$0xff] (!%p2803_p3)  }
 0x1aa   : > { %3048 = vmatprep.subr.bf16.mxu1 %v3475_v5  ;;  %v4755_v25 = vld [vmem:[#allocation15] ss:$0 sm:$0xff]  ;;  %v4757_v27 = vld [vmem:[#allocation18] ss:$0 sm:$0xff] }
 0x1ac   : > { %3025 = vmatpush3.bf16.msra.mxu0 %v3474_v4 }
 0x1ad   : > { %3049 = vmatpush3.bf16.msra.mxu1 %v3475_v5  ;;  %3026 = vmatprep.subr.bf16.mxu0 %v3476_v6 }
 0x1ae   : > { %3050 = vmatprep.subr.bf16.mxu1 %v3477_v7 }
 0x1b0   : > { %3027 = vmatpush3.bf16.msra.mxu0 %v3476_v6 }
 0x1b1   : > { %3051 = vmatpush3.bf16.msra.mxu1 %v3477_v7 }
 0x1b3   : > { %3029 = vmatmul.mubr.msk.bf16.vlgmr.msra.gmra.mrb[0].mxu0 %vm767_vm0, %v3480_v10 }
 0x1b4   : > { %3053 = vmatmul.mubr.msk.bf16.vlgmr.msra.gmra.mrb[0].mxu1 %vm767_vm0, %v3481_v11  ;;  %3032 = vmatprep.mubr.msk.bf16.mxu0 %vm767_vm0, %v3482_v12 }
 0x1b5   : > { %3056 = vmatprep.mubr.msk.bf16.mxu1 %vm767_vm0, %v3483_v13 }
 0x1bb   : > { %3033 = vmatmul.mubr.msk.bf16.gmra.mrb[4].mxu0 %vm767_vm0, %v3484_v14 }
 0x1bc   : > { %3057 = vmatmul.mubr.msk.bf16.gmra.mrb[4].mxu1 %vm767_vm0, %v3485_v15  ;;  %3036 = vmatprep.mubr.msk.bf16.mxu0 %vm767_vm0, %v3486_v16 }
 0x1bd   : > { %3060 = vmatprep.mubr.msk.bf16.mxu1 %vm767_vm0, %v3487_v17 }
 0x1c3   : > { %3037 = vmatmul.mubr.msk.bf16.gmra.mrb[8].mxu0 %vm767_vm0, %v3488_v18 }
 0x1c4   : > { %3061 = vmatmul.mubr.msk.bf16.gmra.mrb[8].mxu1 %vm767_vm0, %v3489_v19  ;;  %3040 = vmatprep.mubr.msk.bf16.mxu0 %vm767_vm0, %v3490_v20 }
 0x1c5   : > { %3064 = vmatprep.mubr.msk.bf16.mxu1 %vm767_vm0, %v3491_v21 }
 0x1cb   : > { %3041 = vmatmul.mubr.msk.bf16.gmra.mrb[12].mxu0 %vm767_vm0, %v3492_v22 }
 0x1cc   : > { %3065 = vmatmul.mubr.msk.bf16.gmra.mrb[12].mxu1 %vm767_vm0, %v3493_v23 }
 0x286   : > { %v3030_v24 = vpop.f32.mrb[0].mxu0 }
 0x287   : > { %v3054_v26 = vpop.f32.mrb[0].mxu1  ;;  %v826_v28 = vpop.f32.mrb[1].mxu0  ;;  %v835_v31 = vadd.f32 %v3030_v24, %v4755_v25 }
 0x288   : > { %v1026_v29 = vpop.f32.mrb[1].mxu1  ;;  %v3031_v30 = vpop.f32.mrb[2].mxu0  ;;  %v1035_v35 = vadd.f32 %v3054_v26, %v4757_v27  ;;  %v827_v36 = vadd.f32 %v4755_v25, %v826_v28 }
 0x289   : > { %v838_v32 = vadd.f32 %v3031_v30, %v4755_v25  ;;  %v3055_v33 = vpop.f32.mrb[2].mxu1  ;;  %v829_v34 = vpop.f32.mrb[3].mxu0  ;;  %v1027_v40 = vadd.f32 %v4757_v27, %v1026_v29 }
 0x28a   : > { %v1038_v37 = vadd.f32 %v3055_v33, %v4757_v27  ;;  %v830_v38 = vadd.f32 %v4755_v25, %v829_v34  ;;  %v1029_v39 = vpop.f32.mrb[3].mxu1 }
 0x28b   : > { %v1090_v41 = vpack.c.bf16 %v838_v32, %v835_v31  ;;  %v1030_v42 = vadd.f32 %v4757_v27, %v1029_v39 }
 0x28c   : > { %v1106_v43 = vpack.c.bf16 %v1038_v37, %v1035_v35  ;;  %v1089_v44 = vpack.c.bf16 %v830_v38, %v827_v36 }
 0x28d   : > { %1098 = vst [vmem:[#allocation2 + $0x8] sm:$0xff] %v1090_v41  ;;  %v1105_v45 = vpack.c.bf16 %v1030_v42, %v1027_v40 }
 0x28e   : > { %1114 = vst [vmem:[#allocation3 + $0x8] sm:$0xff] %v1106_v43  ;;  %1097 = vst [vmem:[#allocation2] sm:$0xff] %v1089_v44  ;;  %v3034_v46 = vpop.f32.mrb[4].mxu0 }
 0x28f   : > { %1113 = vst [vmem:[#allocation3] sm:$0xff] %v1105_v45  ;;  %v3058_v47 = vpop.f32.mrb[4].mxu1  ;;  %v842_v48 = vpop.f32.mrb[5].mxu0  ;;  %v851_v51 = vadd.f32 %v3034_v46, %v4755_v25 }
 0x290   : > { %v1042_v49 = vpop.f32.mrb[5].mxu1  ;;  %v3035_v50 = vpop.f32.mrb[6].mxu0  ;;  %v1051_v55 = vadd.f32 %v3058_v47, %v4757_v27  ;;  %v843_v56 = vadd.f32 %v4755_v25, %v842_v48 }
 0x291   : > { %v854_v52 = vadd.f32 %v3035_v50, %v4755_v25  ;;  %v3059_v53 = vpop.f32.mrb[6].mxu1  ;;  %v845_v54 = vpop.f32.mrb[7].mxu0  ;;  %v1043_v60 = vadd.f32 %v4757_v27, %v1042_v49 }
 0x292   : > { %v1054_v57 = vadd.f32 %v3059_v53, %v4757_v27  ;;  %v846_v58 = vadd.f32 %v4755_v25, %v845_v54  ;;  %v1045_v59 = vpop.f32.mrb[7].mxu1 }
 0x293   : > { %v1092_v61 = vpack.c.bf16 %v854_v52, %v851_v51  ;;  %v1046_v62 = vadd.f32 %v4757_v27, %v1045_v59 }
 0x294   : > { %v1108_v63 = vpack.c.bf16 %v1054_v57, %v1051_v55  ;;  %v1091_v0 = vpack.c.bf16 %v846_v58, %v843_v56 }
 0x295   : > { %1100 = vst [vmem:[#allocation2 + $0x18] sm:$0xff] %v1092_v61  ;;  %v1107_v1 = vpack.c.bf16 %v1046_v62, %v1043_v60 }
 0x296   : > { %1116 = vst [vmem:[#allocation3 + $0x18] sm:$0xff] %v1108_v63  ;;  %1099 = vst [vmem:[#allocation2 + $0x10] sm:$0xff] %v1091_v0  ;;  %v3038_v2 = vpop.f32.mrb[8].mxu0 }
 0x297   : > { %1115 = vst [vmem:[#allocation3 + $0x10] sm:$0xff] %v1107_v1  ;;  %v3062_v3 = vpop.f32.mrb[8].mxu1  ;;  %v858_v4 = vpop.f32.mrb[9].mxu0  ;;  %v867_v7 = vadd.f32 %v3038_v2, %v4755_v25 }
 0x298   : > { %v1058_v5 = vpop.f32.mrb[9].mxu1  ;;  %v3039_v6 = vpop.f32.mrb[10].mxu0  ;;  %v1067_v11 = vadd.f32 %v3062_v3, %v4757_v27  ;;  %v859_v12 = vadd.f32 %v4755_v25, %v858_v4 }
 0x299   : > { %v870_v8 = vadd.f32 %v3039_v6, %v4755_v25  ;;  %v3063_v9 = vpop.f32.mrb[10].mxu1  ;;  %v861_v10 = vpop.f32.mrb[11].mxu0  ;;  %v1059_v16 = vadd.f32 %v4757_v27, %v1058_v5 }
 0x29a   : > { %v1070_v13 = vadd.f32 %v3063_v9, %v4757_v27  ;;  %v862_v14 = vadd.f32 %v4755_v25, %v861_v10  ;;  %v1061_v15 = vpop.f32.mrb[11].mxu1 }
 0x29b   : > { %v1094_v17 = vpack.c.bf16 %v870_v8, %v867_v7  ;;  %v1062_v18 = vadd.f32 %v4757_v27, %v1061_v15 }
 0x29c   : > { %v1110_v19 = vpack.c.bf16 %v1070_v13, %v1067_v11  ;;  %v1093_v20 = vpack.c.bf16 %v862_v14, %v859_v12 }
 0x29d   : > { %1102 = vst [vmem:[#allocation2 + $0x28] sm:$0xff] %v1094_v17  ;;  %v1109_v21 = vpack.c.bf16 %v1062_v18, %v1059_v16 }
 0x29e   : > { %1118 = vst [vmem:[#allocation3 + $0x28] sm:$0xff] %v1110_v19  ;;  %1101 = vst [vmem:[#allocation2 + $0x20] sm:$0xff] %v1093_v20  ;;  %v3042_v22 = vpop.f32.mrb[12].mxu0 }
 0x29f   : > { %1117 = vst [vmem:[#allocation3 + $0x20] sm:$0xff] %v1109_v21  ;;  %v3066_v23 = vpop.f32.mrb[12].mxu1  ;;  %v874_v24 = vpop.f32.mrb[13].mxu0  ;;  %v883_v29 = vadd.f32 %v3042_v22, %v4755_v25 }
 0x2a0   : > { %v1074_v26 = vpop.f32.mrb[13].mxu1  ;;  %v3043_v28 = vpop.f32.mrb[14].mxu0  ;;  %v1083_v33 = vadd.f32 %v3066_v23, %v4757_v27  ;;  %v875_v34 = vadd.f32 %v4755_v25, %v874_v24 }
 0x2a1   : > { %v886_v30 = vadd.f32 %v3043_v28, %v4755_v25  ;;  %v3067_v31 = vpop.f32.mrb[14].mxu1  ;;  %v877_v32 = vpop.f32.mrb[15].mxu0  ;;  %v1075_v38 = vadd.f32 %v4757_v27, %v1074_v26 }
 0x2a2   : > { %v1086_v35 = vadd.f32 %v3067_v31, %v4757_v27  ;;  %v878_v36 = vadd.f32 %v4755_v25, %v877_v32  ;;  %v1077_v37 = vpop.f32.mrb[15].mxu1 }
 0x2a3   : > { %v1096_v39 = vpack.c.bf16 %v886_v30, %v883_v29  ;;  %v1078_v40 = vadd.f32 %v4757_v27, %v1077_v37 }
 0x2a4   : > { %v1112_v41 = vpack.c.bf16 %v1086_v35, %v1083_v33  ;;  %v1095_v42 = vpack.c.bf16 %v878_v36, %v875_v34 }
 0x2a5   : > { %1104 = vst [vmem:[#allocation2 + $0x38] sm:$0xff] %v1096_v39  ;;  %v1111_v43 = vpack.c.bf16 %v1078_v40, %v1075_v38 }
 0x2a6   : > { %1120 = vst [vmem:[#allocation3 + $0x38] sm:$0xff] %v1112_v41  ;;  %1103 = vst [vmem:[#allocation2 + $0x30] sm:$0xff] %v1095_v42 }
 0x2a7   : > { %1119 = vst [vmem:[#allocation3 + $0x30] sm:$0xff] %v1111_v43 }
 0x2a8 PF: > { %v3494_v44 = vld [vmem:[#allocation10] sm:$0xff]   ;;  %v3495_v45 = vld [vmem:[#allocation10 + $0x8] sm:$0xff]   ;;  %v3496_v25 = vld [vmem:[#allocation10 + $0x10] sm:$0xff]   ;;  %vm1272_vm1 = vcmask 523264   ;;  %s5484_s14 = sld [smem:[#allocation37_spill]]  ;;  %s5485_s4 = sld [smem:[#allocation38_spill]] }
 0x2a9   : > { %3068 = vmatprep.subr.bf16.mxu0 %v3494_v44  ;;  %v3498_v27 = vld [vmem:[%s4685_s11] sm:$0xff]   ;;  %v3497_v46 = vld [vmem:[#allocation10 + $0x18] sm:$0xff]   ;;  %v3499_v47 = vld [vmem:[%s4685_s11 + $0x8] sm:$0xff]   ;;  %s5486_s21 = sld [smem:[#allocation54_spill]]  ;;  %s2523_s12 = sshll.u32 %s4720_s6, 4  ;;  %s5200_s12 = int_to_ptr.vmem [resolvable:$true] %s2523_s12 }
 0x2aa   : > { %3069 = vmatpush3.bf16.msra.mxu0 %v3494_v44  ;;  %3076 = vmatprep.mubr.msk.bf16.mxu0 %vm1272_vm1, %v3498_v27  ;;  %v3500_v48 = vld [vmem:[%s4685_s11 + $0x10] sm:$0xff]   ;;  %v1530_v49 = vld [vmem:[#allocation2] sm:$0xff]  ;;  %v1531_v50 = vld [vmem:[#allocation2 + $0x8] sm:$0xff]  ;;  %s2490_s27 = scalar_lea.sflag [#allocation24], %s4681_s18  ;;  %s3964_s8 = scalar_lea.vmem %s5200_s12, 4096 }
 0x2ab   : > { %3070 = vmatprep.subr.bf16.mxu0 %v3495_v45  ;;  %v3501_v51 = vld [vmem:[%s4685_s11 + $0x18] sm:$0xff]   ;;  %3108 = vmatprep.subr.bf16.mxu1 %v1530_v49  ;;  %v3502_v52 = vld [vmem:[%s4685_s11 + $0x20] sm:$0xff]   ;;  %v1532_v53 = vld [vmem:[#allocation2 + $0x10] sm:$0xff]  ;;  %p3965_p13 = scmp.ne.s32.totalorder %s5200_s12, %s3964_s8  ;;  %p5488_p7 = scmp.ne.s32.totalorder %s5460_s7, 0 }
 0x2ac   : > { %3109 = vmatpush3.bf16.xpose.msra.mxu1 %v1530_v49  ;;  %v3503_v54 = vld [vmem:[%s4685_s11 + $0x28] sm:$0xff]   ;;  %v3504_v55 = vld [vmem:[%s4685_s11 + $0x30] sm:$0xff]   ;;  %v1533_v56 = vld [vmem:[#allocation2 + $0x18] sm:$0xff]  ;;  %s4153_s29 = smov [#allocation23]  }
 0x2ad   : > { %3110 = vmatprep.subr.bf16.mxu1 %v1531_v50  ;;  %v3505_v57 = vld [vmem:[%s4685_s11 + $0x38] sm:$0xff]   ;;  %v3506_v58 = vld [vmem:[%s4685_s11 + $0x40] sm:$0xff]   ;;  %v3507_v60 = vld [vmem:[%s4685_s11 + $0x48] sm:$0xff]   ;;  %p3966_p1 = pnand %p3965_p13, %p5488_p7  ;;  %s3968_s20 = sshll.u32 %s4153_s29, 4  ;;  %s3969_s20 = int_to_ptr.vmem [resolvable:$false] %s3968_s20 }
 0x2ae   : > { %3071 = vmatpush3.bf16.msra.mxu0 %v3495_v45  ;;  %v1534_v59 = vld [vmem:[#allocation2 + $0x20] sm:$0xff]  ;;  %v3508_v61 = vld [vmem:[%s4685_s11 + $0x50] sm:$0xff]   ;;  %v1535_v62 = vld [vmem:[#allocation2 + $0x28] sm:$0xff]  ;;  %s2894_s1 = sshll.u32 %s5484_s14, 5  ;;  %s2895_s24 = sshll.u32 %s5485_s4, 6 }
 0x2af   : > { %3072 = vmatprep.subr.bf16.mxu0 %v3496_v25  ;;  %v3509_v63 = vld [vmem:[%s4685_s11 + $0x58] sm:$0xff]   ;;  %v3510_v0 = vld [vmem:[%s4685_s11 + $0x60] sm:$0xff]   ;;  %v1536_v1 = vld [vmem:[#allocation2 + $0x30] sm:$0xff]  ;;  %s5189_s19 = sadd.s32 %s2895_s24, %s2894_s1  ;;  %s5487_s10 = smov %s5486_s21 }
 0x2b0   : > { %v3511_v2 = vld [vmem:[%s4685_s11 + $0x68] sm:$0xff]   ;;  %v3512_v3 = vld [vmem:[%s4685_s11 + $0x70] sm:$0xff]   ;;  %v3513_v4 = vld [vmem:[%s4685_s11 + $0x78] sm:$0xff]   ;;  %s2896_s0 = sshll.u32 %s5189_s19, 7  ;;  %p3967_p11 = pneg %p3966_p1 }
 0x2b1   : > { %v1537_v5 = vld [vmem:[#allocation2 + $0x38] sm:$0xff]  ;;  %v4823_v6 = vld [vmem:[#allocation12] ss:$0 sm:$0xff]  ;;  %s5197_s25 = scalar_lea.hbm %s5486_s21, %s2896_s0  ;;  %s3970_s3 = scalar_lea.vmem %s3969_s20, 8192 }
 0x2b2   : > { %3073 = vmatpush3.bf16.msra.mxu0 %v3496_v25  ;;  %p3971_p5 = scmp.lt.s32.totalorder %s5200_s12, %s3969_s20  ;;  %p3972_p2 = scmp.lt.s32.totalorder %s3970_s3, %s3964_s8 }
 0x2b3   : > { %3074 = vmatprep.subr.bf16.mxu0 %v3497_v46 }
 0x2b4   : > { %3111 = vmatpush3.bf16.xpose.msra.mxu1 %v1531_v50  ;;  %p3973_p0 = por %p3972_p2, %p3971_p5 }
 0x2b5   : > { %3112 = vmatprep.subr.bf16.mxu1 %v1532_v53 }
 0x2b6   : > { %3075 = vmatpush3.bf16.msra.mxu0 %v3497_v46  ;;  %p3974_p8 = pnand %p3973_p0, %p3967_p11 }
 0x2b9   : > { %3077 = vmatmul.mubr.msk.bf16.vlgmr.msra.gmra.mrb[0].mxu0 %vm1272_vm1, %v3499_v47 }
 0x2ba   : > { %3080 = vmatprep.mubr.msk.bf16.mxu0 %vm1272_vm1, %v3500_v48 }
 0x2bc   : > { %3113 = vmatpush3.bf16.xpose.msra.mxu1 %v1532_v53 }
 0x2bd   : > { %3114 = vmatprep.subr.bf16.mxu1 %v1533_v56 }
 0x2c1   : > { %3081 = vmatmul.mubr.msk.bf16.gmra.mrb[4].mxu0 %vm1272_vm1, %v3501_v51 }
 0x2c2   : > { %3084 = vmatprep.mubr.msk.bf16.mxu0 %vm1272_vm1, %v3502_v52 }
 0x2c4   : > { %3115 = vmatpush3.bf16.xpose.msra.mxu1 %v1533_v56 }
 0x2c5   : > { %3116 = vmatprep.subr.bf16.mxu1 %v1534_v59 }
 0x2c9   : > { %3085 = vmatmul.mubr.msk.bf16.gmra.mrb[8].mxu0 %vm1272_vm1, %v3503_v54 }
 0x2ca   : > { %3088 = vmatprep.mubr.msk.bf16.mxu0 %vm1272_vm1, %v3504_v55 }
 0x2cc   : > { %3117 = vmatpush3.bf16.xpose.msra.mxu1 %v1534_v59 }
 0x2cd   : > { %3118 = vmatprep.subr.bf16.mxu1 %v1535_v62 }
 0x2d1   : > { %3089 = vmatmul.mubr.msk.bf16.gmra.mrb[12].mxu0 %vm1272_vm1, %v3505_v57 }
 0x2d2   : > { %3092 = vmatprep.mubr.msk.bf16.mxu0 %vm1272_vm1, %v3506_v58 }
 0x2d4   : > { %3119 = vmatpush3.bf16.xpose.msra.mxu1 %v1535_v62 }
 0x2d5   : > { %3120 = vmatprep.subr.bf16.mxu1 %v1536_v1 }
 0x2d9   : > { %3093 = vmatmul.mubr.msk.bf16.gmra.mrb[16].mxu0 %vm1272_vm1, %v3507_v60 }
 0x2da   : > { %3096 = vmatprep.mubr.msk.bf16.mxu0 %vm1272_vm1, %v3508_v61 }
 0x2dc   : > { %3121 = vmatpush3.bf16.xpose.msra.mxu1 %v1536_v1 }
 0x2dd   : > { %3122 = vmatprep.subr.bf16.mxu1 %v1537_v5 }
 0x2e1   : > { %3097 = vmatmul.mubr.msk.bf16.gmra.mrb[20].mxu0 %vm1272_vm1, %v3509_v63 }
 0x2e2   : > { %3100 = vmatprep.mubr.msk.bf16.mxu0 %vm1272_vm1, %v3510_v0 }
 0x2e4   : > { %3123 = vmatpush3.bf16.xpose.msra.mxu1 %v1537_v5 }
 0x2e9   : > { %3101 = vmatmul.mubr.msk.bf16.gmra.mrb[24].mxu0 %vm1272_vm1, %v3511_v2 }
 0x2ea   : > { %3104 = vmatprep.mubr.msk.bf16.mxu0 %vm1272_vm1, %v3512_v3 }
 0x2f1   : > { %3105 = vmatmul.mubr.msk.bf16.gmra.mrb[28].mxu0 %vm1272_vm1, %v3513_v4 }
 0x38c   : > { %v3078_v7 = vpop.f32.mrb[0].mxu0 }
 0x38d   : > { %v1364_v8 = vadd.f32 %v3078_v7, %v4823_v6  ;;  %v1355_v9 = vpop.f32.mrb[1].mxu0 }
 0x38e   : > { %v1356_v10 = vadd.f32 %v4823_v6, %v1355_v9  ;;  %v3079_v11 = vpop.f32.mrb[2].mxu0 }
 0x38f   : > { %v1367_v12 = vadd.f32 %v3079_v11, %v4823_v6  ;;  %v1358_v13 = vpop.f32.mrb[3].mxu0  ;;  %v1484_v15 = vmul.f32 0.125, %v1364_v8 }
 0x390   : > { %v1359_v14 = vadd.f32 %v4823_v6, %v1358_v13  ;;  %v1482_v17 = vmul.f32 0.125, %v1356_v10 }
 0x391   : > { %v1485_v16 = vmul.f32 0.125, %v1367_v12 }
 0x392   : > { %v1483_v18 = vmul.f32 0.125, %v1359_v14 }
 0x393   : > { %v1515_v19 = vpack.c.bf16 %v1485_v16, %v1484_v15 }
 0x394   : > { %v3082_v20 = vpop.f32.mrb[4].mxu0  ;;  %v1514_v21 = vpack.c.bf16 %v1483_v18, %v1482_v17 }
 0x395   : > { %v1380_v22 = vadd.f32 %v3082_v20, %v4823_v6  ;;  %v1371_v23 = vpop.f32.mrb[5].mxu0 }
 0x396   : > { %v1372_v24 = vadd.f32 %v4823_v6, %v1371_v23  ;;  %v3083_v26 = vpop.f32.mrb[6].mxu0  ;;  %3124 = vmatprep.mubr.bf16.mxu1 %v1514_v21 }
 0x397   : > { %v1488_v28 = vmul.f32 0.125, %v1380_v22  ;;  %v1383_v29 = vadd.f32 %v3083_v26, %v4823_v6  ;;  %v1374_v30 = vpop.f32.mrb[7].mxu0  ;;  %3125 = vmatmul.mubr.bf16.vlgmr.msra.gmra.mrb[0].mxu1 %v1515_v19 }
 0x398   : > { %v1486_v31 = vmul.f32 0.125, %v1372_v24  ;;  %v1375_v32 = vadd.f32 %v4823_v6, %v1374_v30 }
 0x399   : > { %v1489_v33 = vmul.f32 0.125, %v1383_v29 }
 0x39a   : > { %v1487_v34 = vmul.f32 0.125, %v1375_v32 }
 0x39b   : > { %v1517_v35 = vpack.c.bf16 %v1489_v33, %v1488_v28 }
 0x39c   : > { %v1516_v36 = vpack.c.bf16 %v1487_v34, %v1486_v31  ;;  %v3086_v37 = vpop.f32.mrb[8].mxu0 }
 0x39d   : > { %v1396_v38 = vadd.f32 %v3086_v37, %v4823_v6  ;;  %v1387_v39 = vpop.f32.mrb[9].mxu0 }
 0x39e   : > { %v1388_v40 = vadd.f32 %v4823_v6, %v1387_v39  ;;  %v3087_v41 = vpop.f32.mrb[10].mxu0  ;;  %3128 = vmatprep.mubr.bf16.mxu1 %v1516_v36 }
 0x39f   : > { %v1492_v42 = vmul.f32 0.125, %v1396_v38  ;;  %v1399_v43 = vadd.f32 %v3087_v41, %v4823_v6  ;;  %v1390_v44 = vpop.f32.mrb[11].mxu0  ;;  %3129 = vmatmul.mubr.bf16.gmra.mrb[4].mxu1 %v1517_v35 }
 0x3a0   : > { %v1490_v45 = vmul.f32 0.125, %v1388_v40  ;;  %v1391_v25 = vadd.f32 %v4823_v6, %v1390_v44 }
 0x3a1   : > { %v1493_v27 = vmul.f32 0.125, %v1399_v43 }
 0x3a2   : > { %v1491_v46 = vmul.f32 0.125, %v1391_v25 }
 0x3a3   : > { %v1519_v47 = vpack.c.bf16 %v1493_v27, %v1492_v42 }
 0x3a4   : > { %v1518_v48 = vpack.c.bf16 %v1491_v46, %v1490_v45  ;;  %v3090_v49 = vpop.f32.mrb[12].mxu0 }
 0x3a5   : > { %v1412_v50 = vadd.f32 %v3090_v49, %v4823_v6  ;;  %v1403_v51 = vpop.f32.mrb[13].mxu0 }
 0x3a6   : > { %v1404_v52 = vadd.f32 %v4823_v6, %v1403_v51  ;;  %v3091_v53 = vpop.f32.mrb[14].mxu0  ;;  %3132 = vmatprep.mubr.bf16.mxu1 %v1518_v48 }
 0x3a7   : > { %v1496_v54 = vmul.f32 0.125, %v1412_v50  ;;  %v1415_v55 = vadd.f32 %v3091_v53, %v4823_v6  ;;  %v1406_v56 = vpop.f32.mrb[15].mxu0  ;;  %3133 = vmatmul.mubr.bf16.gmra.mrb[8].mxu1 %v1519_v47 }
 0x3a8   : > { %v1494_v57 = vmul.f32 0.125, %v1404_v52  ;;  %v1407_v58 = vadd.f32 %v4823_v6, %v1406_v56 }
 0x3a9   : > { %v1497_v59 = vmul.f32 0.125, %v1415_v55 }
 0x3aa   : > { %v1495_v60 = vmul.f32 0.125, %v1407_v58 }
 0x3ab   : > { %v1521_v61 = vpack.c.bf16 %v1497_v59, %v1496_v54 }
 0x3ac   : > { %v1520_v62 = vpack.c.bf16 %v1495_v60, %v1494_v57  ;;  %v3094_v63 = vpop.f32.mrb[16].mxu0 }
 0x3ad   : > { %v1428_v0 = vadd.f32 %v3094_v63, %v4823_v6  ;;  %v1419_v1 = vpop.f32.mrb[17].mxu0 }
 0x3ae   : > { %v1420_v2 = vadd.f32 %v4823_v6, %v1419_v1  ;;  %v3095_v3 = vpop.f32.mrb[18].mxu0  ;;  %3136 = vmatprep.mubr.bf16.mxu1 %v1520_v62 }
 0x3af   : > { %v1500_v4 = vmul.f32 0.125, %v1428_v0  ;;  %v1431_v5 = vadd.f32 %v3095_v3, %v4823_v6  ;;  %v1422_v7 = vpop.f32.mrb[19].mxu0  ;;  %3137 = vmatmul.mubr.bf16.gmra.mrb[12].mxu1 %v1521_v61 }
 0x3b0   : > { %v1498_v8 = vmul.f32 0.125, %v1420_v2  ;;  %v1423_v9 = vadd.f32 %v4823_v6, %v1422_v7 }
 0x3b1   : > { %v1501_v10 = vmul.f32 0.125, %v1431_v5 }
 0x3b2   : > { %v1499_v11 = vmul.f32 0.125, %v1423_v9 }
 0x3b3   : > { %v1523_v12 = vpack.c.bf16 %v1501_v10, %v1500_v4 }
 0x3b4   : > { %v1522_v13 = vpack.c.bf16 %v1499_v11, %v1498_v8  ;;  %v3098_v14 = vpop.f32.mrb[20].mxu0 }
 0x3b5   : > { %v1444_v15 = vadd.f32 %v3098_v14, %v4823_v6  ;;  %v1435_v16 = vpop.f32.mrb[21].mxu0 }
 0x3b6   : > { %v1436_v17 = vadd.f32 %v4823_v6, %v1435_v16  ;;  %v3099_v18 = vpop.f32.mrb[22].mxu0  ;;  %3140 = vmatprep.mubr.bf16.mxu1 %v1522_v13 }
 0x3b7   : > { %v1504_v19 = vmul.f32 0.125, %v1444_v15  ;;  %v1447_v20 = vadd.f32 %v3099_v18, %v4823_v6  ;;  %v1438_v21 = vpop.f32.mrb[23].mxu0  ;;  %3141 = vmatmul.mubr.bf16.gmra.mrb[16].mxu1 %v1523_v12 }
 0x3b8   : > { %v1502_v22 = vmul.f32 0.125, %v1436_v17  ;;  %v1439_v23 = vadd.f32 %v4823_v6, %v1438_v21 }
 0x3b9   : > { %v1505_v24 = vmul.f32 0.125, %v1447_v20 }
 0x3ba   : > { %v1503_v26 = vmul.f32 0.125, %v1439_v23 }
 0x3bb   : > { %v1525_v28 = vpack.c.bf16 %v1505_v24, %v1504_v19  ;;  %v2003_v24 = vld [vmem:[#allocation3] sm:$0xff] }
 0x3bc   : > { %v1524_v29 = vpack.c.bf16 %v1503_v26, %v1502_v22  ;;  %v3102_v30 = vpop.f32.mrb[24].mxu0  ;;  %v2004_v26 = vld [vmem:[#allocation3 + $0x8] sm:$0xff]  ;;  %3156 = vmatprep.subr.bf16.mxu0 %v2003_v24 }
 0x3bd   : > { %v1460_v31 = vadd.f32 %v3102_v30, %v4823_v6  ;;  %v1451_v32 = vpop.f32.mrb[25].mxu0  ;;  %3157 = vmatpush3.bf16.msra.mxu0 %v2003_v24  ;;  %v2007_v30 = vld [vmem:[#allocation3 + $0x20] sm:$0xff] }
 0x3be   : > { %v1452_v33 = vadd.f32 %v4823_v6, %v1451_v32  ;;  %v3103_v34 = vpop.f32.mrb[26].mxu0  ;;  %3144 = vmatprep.mubr.bf16.mxu1 %v1524_v29  ;;  %3158 = vmatprep.subr.bf16.mxu0 %v2004_v26  ;;  %v2006_v29 = vld [vmem:[#allocation3 + $0x18] sm:$0xff] }
 0x3bf   : > { %v1508_v35 = vmul.f32 0.125, %v1460_v31  ;;  %v1463_v36 = vadd.f32 %v3103_v34, %v4823_v6  ;;  %v1454_v37 = vpop.f32.mrb[27].mxu0  ;;  %3145 = vmatmul.mubr.bf16.gmra.mrb[20].mxu1 %v1525_v28  ;;  %v2005_v28 = vld [vmem:[#allocation3 + $0x10] sm:$0xff]  ;;  %v2008_v31 = vld [vmem:[#allocation3 + $0x28] sm:$0xff] }
 0x3c0   : > { %v1506_v38 = vmul.f32 0.125, %v1452_v33  ;;  %v1455_v39 = vadd.f32 %v4823_v6, %v1454_v37 }
 0x3c1   : > { %v1509_v40 = vmul.f32 0.125, %v1463_v36  ;;  %3159 = vmatpush3.bf16.msra.mxu0 %v2004_v26 }
 0x3c2   : > { %v1507_v41 = vmul.f32 0.125, %v1455_v39  ;;  %3160 = vmatprep.subr.bf16.mxu0 %v2005_v28 }
 0x3c3   : > { %v1527_v42 = vpack.c.bf16 %v1509_v40, %v1508_v35 }
 0x3c4   : > { %v1526_v43 = vpack.c.bf16 %v1507_v41, %v1506_v38  ;;  %v3106_v44 = vpop.f32.mrb[28].mxu0 }
 0x3c5   : > { %v1476_v45 = vadd.f32 %v3106_v44, %v4823_v6  ;;  %v1467_v25 = vpop.f32.mrb[29].mxu0  ;;  %3161 = vmatpush3.bf16.msra.mxu0 %v2005_v28 }
 0x3c6   : > { %v1468_v27 = vadd.f32 %v4823_v6, %v1467_v25  ;;  %v3107_v46 = vpop.f32.mrb[30].mxu0  ;;  %3148 = vmatprep.mubr.bf16.mxu1 %v1526_v43  ;;  %3162 = vmatprep.subr.bf16.mxu0 %v2006_v29 }
 0x3c7   : > { %v1512_v47 = vmul.f32 0.125, %v1476_v45  ;;  %v1479_v48 = vadd.f32 %v3107_v46, %v4823_v6  ;;  %v1470_v49 = vpop.f32.mrb[31].mxu0  ;;  %3149 = vmatmul.mubr.bf16.gmra.mrb[24].mxu1 %v1527_v42 }
 0x3c8   : > { %v1510_v50 = vmul.f32 0.125, %v1468_v27  ;;  %v1471_v51 = vadd.f32 %v4823_v6, %v1470_v49 }
 0x3c9   : > { %v1513_v52 = vmul.f32 0.125, %v1479_v48  ;;  %3163 = vmatpush3.bf16.msra.mxu0 %v2006_v29 }
 0x3ca   : > { %v1511_v53 = vmul.f32 0.125, %v1471_v51  ;;  %3164 = vmatprep.subr.bf16.mxu0 %v2007_v30 }
 0x3cb   : > { %v1529_v54 = vpack.c.bf16 %v1513_v52, %v1512_v47 }
 0x3cc   : > { %v1528_v55 = vpack.c.bf16 %v1511_v53, %v1510_v50 }
 0x3cd   : > { %3165 = vmatpush3.bf16.msra.mxu0 %v2007_v30 }
 0x3ce   : > { %3152 = vmatprep.mubr.bf16.mxu1 %v1528_v55  ;;  %3166 = vmatprep.subr.bf16.mxu0 %v2008_v31 }
 0x3cf   : > { %3153 = vmatmul.mubr.bf16.gmra.mrb[28].mxu1 %v1529_v54 }
 0x3d1   : > { %3167 = vmatpush3.bf16.msra.mxu0 %v2008_v31 }
 0x46a   : > { %v4857_v56 = vpop.f32.mrb[0].mxu1 }
 0x46b   : > { %1703 = vmax.xlane.f32.xlu1 %v4857_v56  ;;  %v4860_v57 = vpop.f32.mrb[1].mxu1 }
 0x46c   : > { %1699 = vmax.xlane.f32.xlu0 %v4860_v57  ;;  %v4863_v58 = vpop.f32.mrb[2].mxu1 }
 0x46d   : > { %v4865_v59 = vpop.f32.mrb[3].mxu1 }
 0x46f   : > { %1705 = vmax.xlane.f32.xlu1 %v4863_v58 }
 0x470   : > { %1701 = vmax.xlane.f32.xlu0 %v4865_v59 }
 0x472   : > { %v4869_v6 = vpop.f32.mrb[4].mxu1 }
 0x473   : > { %v4871_v60 = vpop.f32.mrb[5].mxu1 }
 0x474   : > { %1707 = vmax.xlane.f32.xlu0 %v4871_v60  ;;  %v4874_v61 = vpop.f32.mrb[6].mxu1 }
 0x475   : > { %v4876_v62 = vpop.f32.mrb[7].mxu1 }
 0x476   : > { %1709 = vmax.xlane.f32.xlu1 %v4876_v62 }
 0x478   : > { %1711 = vmax.xlane.f32.xlu0 %v4869_v6 }
 0x47a   : > { %1713 = vmax.xlane.f32.xlu1 %v4874_v61  ;;  %v4881_v63 = vpop.f32.mrb[8].mxu1 }
 0x47b   : > { %v4883_v0 = vpop.f32.mrb[9].mxu1 }
 0x47c   : > { %1715 = vmax.xlane.f32.xlu0 %v4883_v0  ;;  %v4886_v1 = vpop.f32.mrb[10].mxu1 }
 0x47d   : > { %v4888_v2 = vpop.f32.mrb[11].mxu1 }
 0x47e   : > { %1717 = vmax.xlane.f32.xlu1 %v4888_v2 }
 0x480   : > { %1719 = vmax.xlane.f32.xlu0 %v4881_v63 }
 0x482   : > { %1721 = vmax.xlane.f32.xlu1 %v4886_v1  ;;  %v4893_v3 = vpop.f32.mrb[12].mxu1 }
 0x483   : > { %v4895_v4 = vpop.f32.mrb[13].mxu1 }
 0x484   : > { %1723 = vmax.xlane.f32.xlu0 %v4895_v4  ;;  %v4898_v5 = vpop.f32.mrb[14].mxu1 }
 0x485   : > { %v4900_v7 = vpop.f32.mrb[15].mxu1 }
 0x486   : > { %1725 = vmax.xlane.f32.xlu1 %v4900_v7 }
 0x488   : > { %1727 = vmax.xlane.f32.xlu0 %v4893_v3 }
 0x48a   : > { %1729 = vmax.xlane.f32.xlu1 %v4898_v5  ;;  %v4905_v8 = vpop.f32.mrb[16].mxu1 }
 0x48b   : > { %v4907_v9 = vpop.f32.mrb[17].mxu1 }
 0x48c   : > { %1731 = vmax.xlane.f32.xlu0 %v4907_v9  ;;  %v4910_v10 = vpop.f32.mrb[18].mxu1 }
 0x48d   : > { %v4912_v11 = vpop.f32.mrb[19].mxu1 }
 0x48e   : > { %1733 = vmax.xlane.f32.xlu1 %v4912_v11 }
 0x490   : > { %1735 = vmax.xlane.f32.xlu0 %v4905_v8 }
 0x492   : > { %1737 = vmax.xlane.f32.xlu1 %v4910_v10  ;;  %v4917_v12 = vpop.f32.mrb[20].mxu1 }
 0x493   : > { %v4919_v13 = vpop.f32.mrb[21].mxu1 }
 0x494   : > { %1739 = vmax.xlane.f32.xlu0 %v4919_v13  ;;  %v4922_v14 = vpop.f32.mrb[22].mxu1 }
 0x495   : > { %v4924_v15 = vpop.f32.mrb[23].mxu1 }
 0x496   : > { %1741 = vmax.xlane.f32.xlu1 %v4924_v15 }
 0x498   : > { %1743 = vmax.xlane.f32.xlu0 %v4917_v12 }
 0x49a   : > { %1745 = vmax.xlane.f32.xlu1 %v4922_v14  ;;  %v4929_v16 = vpop.f32.mrb[24].mxu1 }
 0x49b   : > { %v4931_v17 = vpop.f32.mrb[25].mxu1 }
 0x49c   : > { %1747 = vmax.xlane.f32.xlu0 %v4931_v17  ;;  %v4934_v18 = vpop.f32.mrb[26].mxu1 }
 0x49d   : > { %v4936_v19 = vpop.f32.mrb[27].mxu1 }
 0x49e   : > { %1749 = vmax.xlane.f32.xlu1 %v4936_v19 }
 0x4a0   : > { %1751 = vmax.xlane.f32.xlu0 %v4929_v16 }
 0x4a2   : > { %1753 = vmax.xlane.f32.xlu1 %v4934_v18  ;;  %v4941_v20 = vpop.f32.mrb[28].mxu1 }
 0x4a3   : > { %v4943_v21 = vpop.f32.mrb[29].mxu1 }
 0x4a4   : > { %1755 = vmax.xlane.f32.xlu0 %v4943_v21  ;;  %v4946_v22 = vpop.f32.mrb[30].mxu1 }
 0x4a5   : > { %v4948_v23 = vpop.f32.mrb[31].mxu1 }
 0x4a6   : > { %1757 = vmax.xlane.f32.xlu1 %v4948_v23 }
 0x4a8   : > { %1759 = vmax.xlane.f32.xlu0 %v4941_v20 }
 0x4aa   : > { %1761 = vmax.xlane.f32.xlu1 %v4946_v22 }
 0x4f8   : > { %v1704_v32 = vpop.xlane.xlu1 %1703 }
 0x4f9   : > { %v1765_v33 = vsub.f32 %v4857_v56, %v1704_v32  ;;  %v1700_v34 = vpop.xlane.xlu0 %1699 }
 0x4fa   : > { %v1763_v35 = vsub.f32 %v4860_v57, %v1700_v34 }
 0x4fb   : > { %v1799_v38 = vmul.f32 1.442695, %v1765_v33 }
 0x4fc   : > { %v1795_v36 = vmul.f32 1.442695, %v1763_v35  ;;  %v1706_v37 = vpop.xlane.xlu1 %1705 }
 0x4fd   : > { %v1766_v39 = vsub.f32 %v4863_v58, %v1706_v37  ;;  %v1702_v40 = vpop.xlane.xlu0 %1701 }
 0x4fe   : > { %3522 = vpow2.f32 %v1795_v36  ;;  %v1764_v41 = vsub.f32 %v4865_v59, %v1702_v40 }
 0x4ff   : > { %3524 = vpow2.f32 %v1799_v38  ;;  %v1801_v43 = vmul.f32 1.442695, %v1766_v39 }
 0x500   : > { %v1797_v42 = vmul.f32 1.442695, %v1764_v41 }
 0x501   : > { %v1708_v44 = vpop.xlane.xlu0 %1707 }
 0x502   : > { %3526 = vpow2.f32 %v1797_v42  ;;  %v1767_v45 = vsub.f32 %v4871_v60, %v1708_v44 }
 0x503   : > { %v1710_v25 = vpop.xlane.xlu1 %1709  ;;  %3528 = vpow2.f32 %v1801_v43 }
 0x504   : > { %v1803_v27 = vmul.f32 1.442695, %v1767_v45  ;;  %v1768_v46 = vsub.f32 %v4876_v62, %v1710_v25 }
 0x505   : > { %v1712_v47 = vpop.xlane.xlu0 %1711 }
 0x506   : > { %3530 = vpow2.f32 %v1803_v27  ;;  %v1805_v48 = vmul.f32 1.442695, %v1768_v46  ;;  %v1769_v49 = vsub.f32 %v4869_v6, %v1712_v47 }
 0x507   : > { %v1714_v50 = vpop.xlane.xlu1 %1713 }
 0x508   : > { %v4960_v51 = vpop.eup %3522  ;;  %v1807_v52 = vmul.f32 1.442695, %v1769_v49  ;;  %v1770_v53 = vsub.f32 %v4874_v61, %v1714_v50  ;;  %3532 = vpow2.f32 %v1805_v48 }
 0x509   : > { %v1716_v54 = vpop.xlane.xlu0 %1715  ;;  %1859 = vadd.xlane.f32.xlu0 %v4960_v51  ;;  %v4965_v57 = vpop.eup %3524 }
 0x50a   : > { %3534 = vpow2.f32 %v1807_v52  ;;  %v1809_v55 = vmul.f32 1.442695, %v1770_v53  ;;  %v1771_v56 = vsub.f32 %v4883_v0, %v1716_v54 }
 0x50b   : > { %v1718_v58 = vpop.xlane.xlu1 %1717 }
 0x50c   : > { %v4967_v59 = vpop.eup %3526  ;;  %v1811_v6 = vmul.f32 1.442695, %v1771_v56  ;;  %v1772_v60 = vsub.f32 %v4888_v2, %v1718_v58  ;;  %3536 = vpow2.f32 %v1809_v55 }
 0x50d   : > { %v1720_v62 = vpop.xlane.xlu0 %1719  ;;  %1863 = vadd.xlane.f32.xlu0 %v4965_v57  ;;  %1861 = vadd.xlane.f32.xlu1 %v4967_v59  ;;  %v4973_v26 = vpop.eup %3528 }
 0x50e   : > { %3538 = vpow2.f32 %v1811_v6  ;;  %v1813_v61 = vmul.f32 1.442695, %v1772_v60  ;;  %v1773_v24 = vsub.f32 %v4881_v63, %v1720_v62 }
 0x50f   : > { %v1722_v0 = vpop.xlane.xlu1 %1721 }
 0x510   : > { %v4975_v28 = vpop.eup %3530  ;;  %v1815_v29 = vmul.f32 1.442695, %v1773_v24  ;;  %v1774_v30 = vsub.f32 %v4886_v1, %v1722_v0  ;;  %3540 = vpow2.f32 %v1813_v61  ;;  %v2009_v24 = vld [vmem:[#allocation3 + $0x30] sm:$0xff] }
 0x511   : > { %v1724_v2 = vpop.xlane.xlu0 %1723  ;;  %1867 = vadd.xlane.f32.xlu0 %v4975_v28  ;;  %1865 = vadd.xlane.f32.xlu1 %v4973_v26 }
 0x512   : > { %3542 = vpow2.f32 %v1815_v29  ;;  %v1817_v31 = vmul.f32 1.442695, %v1774_v30  ;;  %v1775_v32 = vsub.f32 %v4895_v4, %v1724_v2  ;;  %v4981_v33 = vpop.eup %3532  ;;  %3168 = vmatprep.subr.bf16.mxu0 %v2009_v24 }
 0x513   : > { %v1726_v63 = vpop.xlane.xlu1 %1725  ;;  %3169 = vmatpush3.bf16.msra.mxu0 %v2009_v24  ;;  %v5089_v24 = vld [vmem:[#allocation19 + $0x10] sm:$0xff]  }
 0x514   : > { %v4983_v34 = vpop.eup %3534  ;;  %v1819_v35 = vmul.f32 1.442695, %v1775_v32  ;;  %v1776_v36 = vsub.f32 %v4900_v7, %v1726_v63  ;;  %3544 = vpow2.f32 %v1817_v31  ;;  %v2010_v32 = vld [vmem:[#allocation3 + $0x38] sm:$0xff] }
 0x515   : > { %v1728_v1 = vpop.xlane.xlu0 %1727  ;;  %1871 = vadd.xlane.f32.xlu0 %v4983_v34  ;;  %1869 = vadd.xlane.f32.xlu1 %v4981_v33 }
 0x516   : > { %3546 = vpow2.f32 %v1819_v35  ;;  %v1821_v37 = vmul.f32 1.442695, %v1776_v36  ;;  %v1777_v38 = vsub.f32 %v4893_v3, %v1728_v1  ;;  %v4989_v39 = vpop.eup %3536  ;;  %3170 = vmatprep.subr.bf16.mxu0 %v2010_v32 }
 0x517   : > { %v1730_v4 = vpop.xlane.xlu1 %1729  ;;  %3171 = vmatpush3.bf16.msra.mxu0 %v2010_v32 }
 0x518   : > { %v4991_v40 = vpop.eup %3538  ;;  %v1823_v41 = vmul.f32 1.442695, %v1777_v38  ;;  %v1778_v42 = vsub.f32 %v4898_v5, %v1730_v4  ;;  %3548 = vpow2.f32 %v1821_v37 }
 0x519   : > { %v1732_v7 = vpop.xlane.xlu0 %1731  ;;  %1875 = vadd.xlane.f32.xlu0 %v4991_v40  ;;  %1873 = vadd.xlane.f32.xlu1 %v4989_v39 }
 0x51a   : > { %3550 = vpow2.f32 %v1823_v41  ;;  %v1825_v43 = vmul.f32 1.442695, %v1778_v42  ;;  %v1779_v44 = vsub.f32 %v4907_v9, %v1732_v7  ;;  %v4997_v45 = vpop.eup %3540 }
 0x51b   : > { %v1734_v3 = vpop.xlane.xlu1 %1733 }
 0x51c   : > { %v4999_v25 = vpop.eup %3542  ;;  %v1827_v27 = vmul.f32 1.442695, %v1779_v44  ;;  %v1780_v46 = vsub.f32 %v4912_v11, %v1734_v3  ;;  %3552 = vpow2.f32 %v1825_v43 }
 0x51d   : > { %v1736_v5 = vpop.xlane.xlu0 %1735  ;;  %1879 = vadd.xlane.f32.xlu0 %v4999_v25  ;;  %1877 = vadd.xlane.f32.xlu1 %v4997_v45 }
 0x51e   : > { %3554 = vpow2.f32 %v1827_v27  ;;  %v1829_v47 = vmul.f32 1.442695, %v1780_v46  ;;  %v1781_v48 = vsub.f32 %v4905_v8, %v1736_v5  ;;  %v5005_v49 = vpop.eup %3544 }
 0x51f   : > { %v1738_v9 = vpop.xlane.xlu1 %1737 }
 0x520   : > { %v5007_v50 = vpop.eup %3546  ;;  %v1831_v52 = vmul.f32 1.442695, %v1781_v48  ;;  %v1782_v53 = vsub.f32 %v4910_v10, %v1738_v9  ;;  %3556 = vpow2.f32 %v1829_v47 }
 0x521   : > { %v1740_v11 = vpop.xlane.xlu0 %1739  ;;  %1883 = vadd.xlane.f32.xlu0 %v5007_v50  ;;  %1881 = vadd.xlane.f32.xlu1 %v5005_v49 }
 0x522   : > { %3558 = vpow2.f32 %v1831_v52  ;;  %v1833_v54 = vmul.f32 1.442695, %v1782_v53  ;;  %v1783_v55 = vsub.f32 %v4919_v13, %v1740_v11  ;;  %v5013_v56 = vpop.eup %3548 }
 0x523   : > { %v1742_v8 = vpop.xlane.xlu1 %1741 }
 0x524   : > { %v5015_v58 = vpop.eup %3550  ;;  %v1835_v6 = vmul.f32 1.442695, %v1783_v55  ;;  %v1784_v60 = vsub.f32 %v4924_v15, %v1742_v8  ;;  %3560 = vpow2.f32 %v1833_v54 }
 0x525   : > { %v1744_v10 = vpop.xlane.xlu0 %1743  ;;  %1887 = vadd.xlane.f32.xlu0 %v5015_v58  ;;  %1885 = vadd.xlane.f32.xlu1 %v5013_v56 }
 0x526   : > { %3562 = vpow2.f32 %v1835_v6  ;;  %v1837_v62 = vmul.f32 1.442695, %v1784_v60  ;;  %v1785_v61 = vsub.f32 %v4917_v12, %v1744_v10  ;;  %v5021_v13 = vpop.eup %3552 }
 0x527   : > { %v1746_v0 = vpop.xlane.xlu1 %1745 }
 0x528   : > { %v5023_v29 = vpop.eup %3554  ;;  %v1839_v30 = vmul.f32 1.442695, %v1785_v61  ;;  %v1786_v15 = vsub.f32 %v4922_v14, %v1746_v0  ;;  %3564 = vpow2.f32 %v1837_v62  ;;  %v5081_v62 = vld [vmem:[#allocation19] sm:$0xff]   ;;  %v5084_v61 = vld [vmem:[#allocation19 + $0x8] sm:$0xff]   ;;  %v5093_v0 = vld [vmem:[#allocation19 + $0x18] sm:$0xff]  }
 0x529   : > { %v1748_v2 = vpop.xlane.xlu0 %1747  ;;  %1891 = vadd.xlane.f32.xlu0 %v5023_v29  ;;  %1889 = vadd.xlane.f32.xlu1 %v5021_v13 }
 0x52a   : > { %3566 = vpow2.f32 %v1839_v30  ;;  %v1841_v31 = vmul.f32 1.442695, %v1786_v15  ;;  %v1787_v12 = vsub.f32 %v4931_v17, %v1748_v2  ;;  %v5029_v63 = vpop.eup %3556  ;;  %3252 = vmatprep.subr.bf16.mxu1 %v5081_v62  ;;  %3204 = vmatprep.subr.bf16.mxu0 %v5081_v62  ;;  %v5097_v30 = vld [vmem:[#allocation19 + $0x20] sm:$0xff]   ;;  %v5101_v15 = vld [vmem:[#allocation19 + $0x28] sm:$0xff]   ;;  %v5105_v2 = vld [vmem:[#allocation19 + $0x30] sm:$0xff]  }
 0x52b   : > { %v1750_v35 = vpop.xlane.xlu1 %1749  ;;  %3260 = vmatpush3.bf16.msra.mxu1 %v5081_v62 }
 0x52c   : > { %v5031_v36 = vpop.eup %3558  ;;  %v1843_v1 = vmul.f32 1.442695, %v1787_v12  ;;  %v1788_v14 = vsub.f32 %v4936_v19, %v1750_v35  ;;  %3568 = vpow2.f32 %v1841_v31  ;;  %3253 = vmatprep.subr.bf16.mxu1 %v5084_v61 }
 0x52d   : > { %v1752_v37 = vpop.xlane.xlu0 %1751  ;;  %1895 = vadd.xlane.f32.xlu0 %v5031_v36  ;;  %1893 = vadd.xlane.f32.xlu1 %v5029_v63 }
 0x52e   : > { %3570 = vpow2.f32 %v1843_v1  ;;  %v1845_v38 = vmul.f32 1.442695, %v1788_v14  ;;  %v1789_v17 = vsub.f32 %v4929_v16, %v1752_v37  ;;  %v5037_v4 = vpop.eup %3560 }
 0x52f   : > { %v1754_v41 = vpop.xlane.xlu1 %1753  ;;  %3261 = vmatpush3.bf16.msra.mxu1 %v5084_v61 }
 0x530   : > { %v5039_v42 = vpop.eup %3562  ;;  %v1847_v7 = vmul.f32 1.442695, %v1789_v17  ;;  %v1790_v43 = vsub.f32 %v4934_v18, %v1754_v41  ;;  %3572 = vpow2.f32 %v1845_v38  ;;  %3254 = vmatprep.subr.bf16.mxu1 %v5089_v24 }
 0x531   : > { %1899 = vadd.xlane.f32.xlu0 %v5039_v42  ;;  %v1756_v19 = vpop.xlane.xlu0 %1755  ;;  %1897 = vadd.xlane.f32.xlu1 %v5037_v4 }
 0x532   : > { %3574 = vpow2.f32 %v1847_v7  ;;  %v1849_v44 = vmul.f32 1.442695, %v1790_v43  ;;  %v1791_v3 = vsub.f32 %v4943_v21, %v1756_v19  ;;  %v5045_v27 = vpop.eup %3564 }
 0x533   : > { %v1758_v16 = vpop.xlane.xlu1 %1757  ;;  %3262 = vmatpush3.bf16.msra.mxu1 %v5089_v24 }
 0x534   : > { %v5047_v46 = vpop.eup %3566  ;;  %v1851_v5 = vmul.f32 1.442695, %v1791_v3  ;;  %v1792_v47 = vsub.f32 %v4948_v23, %v1758_v16  ;;  %3576 = vpow2.f32 %v1849_v44  ;;  %3255 = vmatprep.subr.bf16.mxu1 %v5093_v0 }
 0x535   : > { %1903 = vadd.xlane.f32.xlu0 %v5047_v46  ;;  %v1760_v18 = vpop.xlane.xlu0 %1759  ;;  %1901 = vadd.xlane.f32.xlu1 %v5045_v27 }
 0x536   : > { %3578 = vpow2.f32 %v1851_v5  ;;  %v1853_v48 = vmul.f32 1.442695, %v1792_v47  ;;  %v1793_v9 = vsub.f32 %v4941_v20, %v1760_v18  ;;  %v5053_v52 = vpop.eup %3568 }
 0x537   : > { %v1762_v21 = vpop.xlane.xlu1 %1761  ;;  %3263 = vmatpush3.bf16.msra.mxu1 %v5093_v0 }
 0x538   : > { %v5055_v53 = vpop.eup %3570  ;;  %v1855_v11 = vmul.f32 1.442695, %v1793_v9  ;;  %v1794_v54 = vsub.f32 %v4946_v22, %v1762_v21  ;;  %3580 = vpow2.f32 %v1853_v48  ;;  %3256 = vmatprep.subr.bf16.mxu1 %v5097_v30 }
 0x539   : > { %1907 = vadd.xlane.f32.xlu0 %v5055_v53  ;;  %1905 = vadd.xlane.f32.xlu1 %v5053_v52 }
 0x53a   : > { %3582 = vpow2.f32 %v1855_v11  ;;  %v1857_v23 = vmul.f32 1.442695, %v1794_v54  ;;  %v5060_v55 = vpop.eup %3572 }
 0x53b   : > { %3264 = vmatpush3.bf16.msra.mxu1 %v5097_v30 }
 0x53c   : > { %v5062_v8 = vpop.eup %3574  ;;  %3584 = vpow2.f32 %v1857_v23  ;;  %3257 = vmatprep.subr.bf16.mxu1 %v5101_v15 }
 0x53d   : > { %1911 = vadd.xlane.f32.xlu0 %v5062_v8  ;;  %1909 = vadd.xlane.f32.xlu1 %v5060_v55 }
 0x53e   : > { %v5066_v20 = vpop.eup %3576 }
 0x53f   : > { %3265 = vmatpush3.bf16.msra.mxu1 %v5101_v15 }
 0x540   : > { %v5068_v6 = vpop.eup %3578  ;;  %3258 = vmatprep.subr.bf16.mxu1 %v5105_v2 }
 0x541   : > { %1915 = vadd.xlane.f32.xlu0 %v5068_v6  ;;  %1913 = vadd.xlane.f32.xlu1 %v5066_v20 }
 0x542   : > { %v5072_v22 = vpop.eup %3580 }
 0x543   : > { %3266 = vmatpush3.bf16.msra.mxu1 %v5105_v2 }
 0x544   : > { %v5074_v60 = vpop.eup %3582 }
 0x545   : > { %1919 = vadd.xlane.f32.xlu0 %v5074_v60  ;;  %1917 = vadd.xlane.f32.xlu1 %v5072_v22 }
 0x546   : > { %v5078_v10 = vpop.eup %3584 }
 0x549   : > { %1921 = vadd.xlane.f32.xlu1 %v5078_v10 }
 0x596   : > { %v1860_v31 = vpop.xlane.xlu0 %1859 }
 0x597   : > { %3586 = vrcp.f32 %v1860_v31 }
 0x59a   : > { %v1864_v12 = vpop.xlane.xlu0 %1863  ;;  %v1862_v32 = vpop.xlane.xlu1 %1861 }
 0x59b   : > { %3588 = vrcp.f32 %v1864_v12 }
 0x59c   : > { %3590 = vrcp.f32 %v1862_v32 }
 0x59e   : > { %v1868_v35 = vpop.xlane.xlu0 %1867  ;;  %v1866_v1 = vpop.xlane.xlu1 %1865 }
 0x59f   : > { %3592 = vrcp.f32 %v1868_v35 }
 0x5a0   : > { %3594 = vrcp.f32 %v1866_v1 }
 0x5a1   : > { %v3587_v14 = vpop.eup %3586 }
 0x5a2   : > { %v1872_v37 = vpop.xlane.xlu0 %1871  ;;  %v1870_v38 = vpop.xlane.xlu1 %1869  ;;  %v1955_v17 = vmul.f32 %v3587_v14, %v4960_v51 }
 0x5a3   : > { %3596 = vrcp.f32 %v1872_v37 }
 0x5a4   : > { %3598 = vrcp.f32 %v1870_v38  ;;  %2452 = vst [vmem:[%s4720_s6] sm:$0xff] %v1955_v17 }
 0x5a5   : > { %v3589_v41 = vpop.eup %3588 }
 0x5a6   : > { %v3591_v7 = vpop.eup %3590  ;;  %v1957_v43 = vmul.f32 %v3589_v41, %v4965_v57  ;;  %v1876_v19 = vpop.xlane.xlu0 %1875 }
 0x5a7   : > { %v1874_v44 = vpop.xlane.xlu1 %1873  ;;  %3600 = vrcp.f32 %v1876_v19  ;;  %v1956_v3 = vmul.f32 %v3591_v7, %v4967_v59 }
 0x5a8   : > { %2454 = vst [vmem:[%s4720_s6 + $0x10] sm:$0xff] %v1957_v43  ;;  %3602 = vrcp.f32 %v1874_v44 }
 0x5a9   : > { %v3593_v16 = vpop.eup %3592  ;;  %v1987_v5 = vpack.c.bf16 %v1956_v3, %v1955_v17  ;;  %2453 = vst [vmem:[%s4720_s6 + $0x8] sm:$0xff] %v1956_v3 }
 0x5aa   : > { %v3595_v51 = vpop.eup %3594  ;;  %v1880_v47 = vpop.xlane.xlu0 %1879  ;;  %v1959_v48 = vmul.f32 %v3593_v16, %v4975_v28 }
 0x5ab   : > { %v1878_v18 = vpop.xlane.xlu1 %1877  ;;  %v1958_v9 = vmul.f32 %v3595_v51, %v4973_v26  ;;  %3604 = vrcp.f32 %v1880_v47  ;;  %3172 = vmatprep.mubr.bf16.mxu0 %v1987_v5 }
 0x5ac   : > { %3606 = vrcp.f32 %v1878_v18  ;;  %2456 = vst [vmem:[%s4720_s6 + $0x20] sm:$0xff] %v1959_v48 }
 0x5ad   : > { %v3597_v57 = vpop.eup %3596  ;;  %2455 = vst [vmem:[%s4720_s6 + $0x18] sm:$0xff] %v1958_v9  ;;  %v1988_v59 = vpack.c.bf16 %v1958_v9, %v1957_v43 }
 0x5ae   : > { %v3599_v21 = vpop.eup %3598  ;;  %v1884_v11 = vpop.xlane.xlu0 %1883  ;;  %v1961_v23 = vmul.f32 %v3597_v57, %v4983_v34 }
 0x5af   : > { %v1882_v54 = vpop.xlane.xlu1 %1881  ;;  %3608 = vrcp.f32 %v1884_v11  ;;  %3173 = vmatmul.mubr.bf16.vlgmr.msra.gmra.mrb[32].mxu0 %v1988_v59  ;;  %v1960_v28 = vmul.f32 %v3599_v21, %v4981_v33 }
 0x5b0   : > { %3610 = vrcp.f32 %v1882_v54  ;;  %2458 = vst [vmem:[%s4720_s6 + $0x30] sm:$0xff] %v1961_v23  ;;  %3205 = vmatpush3.bf16.msra.mxu0 %v5081_v62 }
 0x5b1   : > { %v3601_v26 = vpop.eup %3600  ;;  %v1989_v31 = vpack.c.bf16 %v1960_v28, %v1959_v48  ;;  %2457 = vst [vmem:[%s4720_s6 + $0x28] sm:$0xff] %v1960_v28  ;;  %3206 = vmatprep.subr.bf16.mxu0 %v5084_v61 }
 0x5b2   : > { %v3603_v12 = vpop.eup %3602  ;;  %v1888_v32 = vpop.xlane.xlu0 %1887  ;;  %v1963_v34 = vmul.f32 %v3601_v26, %v4991_v40 }
 0x5b3   : > { %v1886_v35 = vpop.xlane.xlu1 %1885  ;;  %3612 = vrcp.f32 %v1888_v32  ;;  %3176 = vmatprep.mubr.bf16.mxu0 %v1989_v31  ;;  %v1962_v33 = vmul.f32 %v3603_v12, %v4989_v39 }
 0x5b4   : > { %3614 = vrcp.f32 %v1886_v35  ;;  %2460 = vst [vmem:[%s4720_s6 + $0x40] sm:$0xff] %v1963_v34  ;;  %3207 = vmatpush3.bf16.msra.mxu0 %v5084_v61 }
 0x5b5   : > { %v3605_v62 = vpop.eup %3604  ;;  %v1990_v1 = vpack.c.bf16 %v1962_v33, %v1961_v23  ;;  %2459 = vst [vmem:[%s4720_s6 + $0x38] sm:$0xff] %v1962_v33  ;;  %3208 = vmatprep.subr.bf16.mxu0 %v5089_v24 }
 0x5b6   : > { %v3607_v14 = vpop.eup %3606  ;;  %v1892_v37 = vpop.xlane.xlu0 %1891  ;;  %v1965_v40 = vmul.f32 %v3605_v62, %v4999_v25 }
 0x5b7   : > { %v1890_v38 = vpop.xlane.xlu1 %1889  ;;  %3616 = vrcp.f32 %v1892_v37  ;;  %3177 = vmatmul.mubr.bf16.gmra.mrb[36].mxu0 %v1990_v1  ;;  %v1964_v39 = vmul.f32 %v3607_v14, %v4997_v45 }
 0x5b8   : > { %3618 = vrcp.f32 %v1890_v38  ;;  %2462 = vst [vmem:[%s4720_s6 + $0x50] sm:$0xff] %v1965_v40  ;;  %3209 = vmatpush3.bf16.msra.mxu0 %v5089_v24 }
 0x5b9   : > { %v3609_v61 = vpop.eup %3608  ;;  %v1991_v17 = vpack.c.bf16 %v1964_v39, %v1963_v34  ;;  %2461 = vst [vmem:[%s4720_s6 + $0x48] sm:$0xff] %v1964_v39  ;;  %3210 = vmatprep.subr.bf16.mxu0 %v5093_v0 }
 0x5ba   : > { %v3611_v41 = vpop.eup %3610  ;;  %v1896_v7 = vpop.xlane.xlu0 %1895  ;;  %v1967_v25 = vmul.f32 %v3609_v61, %v5007_v50 }
 0x5bb   : > { %v1894_v43 = vpop.xlane.xlu1 %1893  ;;  %3620 = vrcp.f32 %v1896_v7  ;;  %3180 = vmatprep.mubr.bf16.mxu0 %v1991_v17  ;;  %v1966_v45 = vmul.f32 %v3611_v41, %v5005_v49 }
 0x5bc   : > { %3622 = vrcp.f32 %v1894_v43  ;;  %2464 = vst [vmem:[%s4720_s6 + $0x60] sm:$0xff] %v1967_v25  ;;  %3211 = vmatpush3.bf16.msra.mxu0 %v5093_v0 }
 0x5bd   : > { %v3613_v24 = vpop.eup %3612  ;;  %v1992_v19 = vpack.c.bf16 %v1966_v45, %v1965_v40  ;;  %2463 = vst [vmem:[%s4720_s6 + $0x58] sm:$0xff] %v1966_v45  ;;  %3212 = vmatprep.subr.bf16.mxu0 %v5097_v30 }
 0x5be   : > { %v3615_v44 = vpop.eup %3614  ;;  %v1900_v3 = vpop.xlane.xlu0 %1899  ;;  %v1969_v50 = vmul.f32 %v3613_v24, %v5015_v58 }
 0x5bf   : > { %v1898_v16 = vpop.xlane.xlu1 %1897  ;;  %3624 = vrcp.f32 %v1900_v3  ;;  %3181 = vmatmul.mubr.bf16.gmra.mrb[40].mxu0 %v1992_v19  ;;  %v1968_v49 = vmul.f32 %v3615_v44, %v5013_v56 }
 0x5c0   : > { %3626 = vrcp.f32 %v1898_v16  ;;  %2466 = vst [vmem:[%s4720_s6 + $0x70] sm:$0xff] %v1969_v50  ;;  %3213 = vmatpush3.bf16.msra.mxu0 %v5097_v30 }
 0x5c1   : > { %v3617_v0 = vpop.eup %3616  ;;  %v1993_v5 = vpack.c.bf16 %v1968_v49, %v1967_v25  ;;  %2465 = vst [vmem:[%s4720_s6 + $0x68] sm:$0xff] %v1968_v49  ;;  %3214 = vmatprep.subr.bf16.mxu0 %v5101_v15 }
 0x5c2   : > { %v3619_v51 = vpop.eup %3618  ;;  %v1904_v47 = vpop.xlane.xlu0 %1903  ;;  %v1971_v58 = vmul.f32 %v3617_v0, %v5023_v29 }
 0x5c3   : > { %v1902_v18 = vpop.xlane.xlu1 %1901  ;;  %3628 = vrcp.f32 %v1904_v47  ;;  %3184 = vmatprep.mubr.bf16.mxu0 %v1993_v5  ;;  %v1970_v56 = vmul.f32 %v3619_v51, %v5021_v13 }
 0x5c4   : > { %3630 = vrcp.f32 %v1902_v18  ;;  %2468 = vst [vmem:[%s4720_s6 + $0x80] sm:$0xff] %v1971_v58  ;;  %3215 = vmatpush3.bf16.msra.mxu0 %v5101_v15 }
 0x5c5   : > { %v3621_v30 = vpop.eup %3620  ;;  %v1994_v48 = vpack.c.bf16 %v1970_v56, %v1969_v50  ;;  %2467 = vst [vmem:[%s4720_s6 + $0x78] sm:$0xff] %v1970_v56  ;;  %3216 = vmatprep.subr.bf16.mxu0 %v5105_v2 }
 0x5c6   : > { %v3623_v9 = vpop.eup %3622  ;;  %v1908_v57 = vpop.xlane.xlu0 %1907  ;;  %v1973_v29 = vmul.f32 %v3621_v30, %v5031_v36 }
 0x5c7   : > { %v1906_v59 = vpop.xlane.xlu1 %1905  ;;  %3632 = vrcp.f32 %v1908_v57  ;;  %3185 = vmatmul.mubr.bf16.gmra.mrb[44].mxu0 %v1994_v48  ;;  %v1972_v13 = vmul.f32 %v3623_v9, %v5029_v63 }
 0x5c8   : > { %3634 = vrcp.f32 %v1906_v59  ;;  %2470 = vst [vmem:[%s4720_s6 + $0x90] sm:$0xff] %v1973_v29  ;;  %3217 = vmatpush3.bf16.msra.mxu0 %v5105_v2 }
 0x5c9   : > { %v3625_v15 = vpop.eup %3624  ;;  %v1995_v21 = vpack.c.bf16 %v1972_v13, %v1971_v58  ;;  %2469 = vst [vmem:[%s4720_s6 + $0x88] sm:$0xff] %v1972_v13 }
 0x5ca   : > { %v3627_v11 = vpop.eup %3626  ;;  %v1912_v54 = vpop.xlane.xlu0 %1911  ;;  %v1975_v28 = vmul.f32 %v3625_v15, %v5039_v42 }
 0x5cb   : > { %v1910_v23 = vpop.xlane.xlu1 %1909  ;;  %3636 = vrcp.f32 %v1912_v54  ;;  %3188 = vmatprep.mubr.bf16.mxu0 %v1995_v21  ;;  %v1974_v36 = vmul.f32 %v3627_v11, %v5037_v4 }
 0x5cc   : > { %3638 = vrcp.f32 %v1910_v23  ;;  %2472 = vst [vmem:[%s4720_s6 + $0xa0] sm:$0xff] %v1975_v28 }
 0x5cd   : > { %v3629_v63 = vpop.eup %3628  ;;  %v1996_v26 = vpack.c.bf16 %v1974_v36, %v1973_v29  ;;  %2471 = vst [vmem:[%s4720_s6 + $0x98] sm:$0xff] %v1974_v36 }
 0x5ce   : > { %v3631_v2 = vpop.eup %3630  ;;  %v1916_v31 = vpop.xlane.xlu0 %1915  ;;  %v1977_v32 = vmul.f32 %v3629_v63, %v5047_v46 }
 0x5cf   : > { %v1914_v12 = vpop.xlane.xlu1 %1913  ;;  %3640 = vrcp.f32 %v1916_v31  ;;  %3189 = vmatmul.mubr.bf16.gmra.mrb[48].mxu0 %v1996_v26  ;;  %v1976_v42 = vmul.f32 %v3631_v2, %v5045_v27 }
 0x5d0   : > { %3642 = vrcp.f32 %v1914_v12  ;;  %2474 = vst [vmem:[%s4720_s6 + $0xb0] sm:$0xff] %v1977_v32 }
 0x5d1   : > { %v3633_v4 = vpop.eup %3632  ;;  %v1997_v35 = vpack.c.bf16 %v1976_v42, %v1975_v28  ;;  %2473 = vst [vmem:[%s4720_s6 + $0xa8] sm:$0xff] %v1976_v42 }
 0x5d2   : > { %v3635_v34 = vpop.eup %3634  ;;  %v1920_v33 = vpop.xlane.xlu0 %1919  ;;  %v1979_v1 = vmul.f32 %v3633_v4, %v5055_v53 }
 0x5d3   : > { %v1918_v62 = vpop.xlane.xlu1 %1917  ;;  %3644 = vrcp.f32 %v1920_v33  ;;  %3192 = vmatprep.mubr.bf16.mxu0 %v1997_v35  ;;  %v1978_v46 = vmul.f32 %v3635_v34, %v5053_v52 }
 0x5d4   : > { %3646 = vrcp.f32 %v1918_v62  ;;  %2476 = vst [vmem:[%s4720_s6 + $0xc0] sm:$0xff] %v1979_v1 }
 0x5d5   : > { %v3637_v27 = vpop.eup %3636  ;;  %v1998_v14 = vpack.c.bf16 %v1978_v46, %v1977_v32  ;;  %2475 = vst [vmem:[%s4720_s6 + $0xb8] sm:$0xff] %v1978_v46 }
 0x5d6   : > { %v3639_v37 = vpop.eup %3638  ;;  %v1981_v40 = vmul.f32 %v3637_v27, %v5062_v8 }
 0x5d7   : > { %v1922_v38 = vpop.xlane.xlu1 %1921  ;;  %3193 = vmatmul.mubr.bf16.gmra.mrb[52].mxu0 %v1998_v14  ;;  %v1980_v53 = vmul.f32 %v3639_v37, %v5060_v55 }
 0x5d8   : > { %3648 = vrcp.f32 %v1922_v38  ;;  %2478 = vst [vmem:[%s4720_s6 + $0xd0] sm:$0xff] %v1981_v40 }
 0x5d9   : > { %v3641_v39 = vpop.eup %3640  ;;  %v1999_v61 = vpack.c.bf16 %v1980_v53, %v1979_v1  ;;  %2477 = vst [vmem:[%s4720_s6 + $0xc8] sm:$0xff] %v1980_v53 }
 0x5da   : > { %v3643_v52 = vpop.eup %3642  ;;  %v1983_v17 = vmul.f32 %v3641_v39, %v5068_v6 }
 0x5db   : > { %3196 = vmatprep.mubr.bf16.mxu0 %v1999_v61  ;;  %v1982_v41 = vmul.f32 %v3643_v52, %v5066_v20  ;;  %v3521_v20 = vld [vmem:[#allocation19 + $0x38] sm:$0xff]  }
 0x5dc   : > { %2480 = vst [vmem:[%s4720_s6 + $0xe0] sm:$0xff] %v1983_v17  ;;  %3218 = vmatprep.subr.bf16.mxu0 %v3521_v20  ;;  %3259 = vmatprep.subr.bf16.mxu1 %v3521_v20 }
 0x5dd   : > { %v3645_v7 = vpop.eup %3644  ;;  %v2000_v8 = vpack.c.bf16 %v1982_v41, %v1981_v40  ;;  %2479 = vst [vmem:[%s4720_s6 + $0xd8] sm:$0xff] %v1982_v41  ;;  %3219 = vmatpush3.bf16.msra.mxu0 %v3521_v20  ;;  %3267 = vmatpush3.bf16.msra.mxu1 %v3521_v20 }
 0x5de   : > { %v3647_v43 = vpop.eup %3646  ;;  %v1985_v55 = vmul.f32 %v3645_v7, %v5074_v60 }
 0x5df   : > { %3197 = vmatmul.mubr.bf16.gmra.mrb[56].mxu0 %v2000_v8  ;;  %v1984_v25 = vmul.f32 %v3647_v43, %v5072_v22 }
 0x5e0   : > { %2482 = vst [vmem:[%s4720_s6 + $0xf0] sm:$0xff] %v1985_v55 }
 0x5e1   : > { %v2001_v24 = vpack.c.bf16 %v1984_v25, %v1983_v17  ;;  %2481 = vst [vmem:[%s4720_s6 + $0xe8] sm:$0xff] %v1984_v25 }
 0x5e2   : > { %v3649_v45 = vpop.eup %3648 }
 0x5e3   : > { %v1986_v6 = vmul.f32 %v3649_v45, %v5078_v10  ;;  %3200 = vmatprep.mubr.bf16.mxu0 %v2001_v24 }
 0x5e5   : > { %v2002_v19 = vpack.c.bf16 %v1986_v6, %v1985_v55  ;;  %2483 = vst [vmem:[%s4720_s6 + $0xf8] sm:$0xff] %v1986_v6 }
 0x5e7   : > { %3201 = vmatmul.mubr.bf16.gmra.mrb[60].mxu0 %v2002_v19 }
 0x682   : > { %v3174_v44 = vpop.f32.mrb[32].mxu0 }
 0x683   : > { %v2045_v60 = vpop.f32.mrb[33].mxu0 }
 0x684   : > { %v3175_v3 = vpop.f32.mrb[34].mxu0 }
 0x685   : > { %v2173_v16 = vpack.c.bf16 %v3175_v3, %v3174_v44  ;;  %v2048_v22 = vpop.f32.mrb[35].mxu0 }
 0x686   : > { %v2172_v50 = vpack.c.bf16 %v2048_v22, %v2045_v60 }
 0x688   : > { %3220 = vmatprep.mubr.bf16.mxu0 %v2172_v50 }
 0x689   : > { %3221 = vmatmul.mubr.bf16.vlgmr.msra.gmra.mrb[64].mxu0 %v2173_v16 }
 0x68a   : > { %v3178_v49 = vpop.f32.mrb[36].mxu0 }
 0x68b   : > { %v2061_v0 = vpop.f32.mrb[37].mxu0 }
 0x68c   : > { %v3179_v10 = vpop.f32.mrb[38].mxu0 }
 0x68d   : > { %v2175_v5 = vpack.c.bf16 %v3179_v10, %v3178_v49  ;;  %v2064_v51 = vpop.f32.mrb[39].mxu0 }
 0x68e   : > { %v2174_v47 = vpack.c.bf16 %v2064_v51, %v2061_v0 }
 0x690   : > { %3224 = vmatprep.mubr.bf16.mxu0 %v2174_v47 }
 0x691   : > { %3225 = vmatmul.mubr.bf16.gmra.mrb[68].mxu0 %v2175_v5 }
 0x692   : > { %v3182_v18 = vpop.f32.mrb[40].mxu0 }
 0x693   : > { %v2077_v58 = vpop.f32.mrb[41].mxu0 }
 0x694   : > { %v3183_v56 = vpop.f32.mrb[42].mxu0 }
 0x695   : > { %v2177_v30 = vpack.c.bf16 %v3183_v56, %v3182_v18  ;;  %v2080_v48 = vpop.f32.mrb[43].mxu0 }
 0x696   : > { %v2176_v9 = vpack.c.bf16 %v2080_v48, %v2077_v58 }
 0x698   : > { %3228 = vmatprep.mubr.bf16.mxu0 %v2176_v9 }
 0x699   : > { %3229 = vmatmul.mubr.bf16.gmra.mrb[72].mxu0 %v2177_v30 }
 0x69a   : > { %v3186_v57 = vpop.f32.mrb[44].mxu0 }
 0x69b   : > { %v2093_v59 = vpop.f32.mrb[45].mxu0 }
 0x69c   : > { %v3187_v29 = vpop.f32.mrb[46].mxu0 }
 0x69d   : > { %v2179_v13 = vpack.c.bf16 %v3187_v29, %v3186_v57  ;;  %v2096_v15 = vpop.f32.mrb[47].mxu0 }
 0x69e   : > { %v2178_v21 = vpack.c.bf16 %v2096_v15, %v2093_v59 }
 0x6a0   : > { %3232 = vmatprep.mubr.bf16.mxu1 %v2178_v21 }
 0x6a1   : > { %3233 = vmatmul.mubr.bf16.vlgmr.msra.gmra.mrb[32].mxu1 %v2179_v13 }
 0x6a2   : > { %v3190_v11 = vpop.f32.mrb[48].mxu0 }
 0x6a3   : > { %v2109_v54 = vpop.f32.mrb[49].mxu0 }
 0x6a4   : > { %v3191_v23 = vpop.f32.mrb[50].mxu0 }
 0x6a5   : > { %v2181_v28 = vpack.c.bf16 %v3191_v23, %v3190_v11  ;;  %v2112_v36 = vpop.f32.mrb[51].mxu0 }
 0x6a6   : > { %v2180_v63 = vpack.c.bf16 %v2112_v36, %v2109_v54 }
 0x6a8   : > { %3236 = vmatprep.mubr.bf16.mxu1 %v2180_v63 }
 0x6a9   : > { %3237 = vmatmul.mubr.bf16.gmra.mrb[36].mxu1 %v2181_v28 }
 0x6aa   : > { %v3194_v26 = vpop.f32.mrb[52].mxu0 }
 0x6ab   : > { %v2125_v2 = vpop.f32.mrb[53].mxu0 }
 0x6ac   : > { %v3195_v31 = vpop.f32.mrb[54].mxu0 }
 0x6ad   : > { %v2183_v12 = vpack.c.bf16 %v3195_v31, %v3194_v26  ;;  %v2128_v32 = vpop.f32.mrb[55].mxu0 }
 0x6ae   : > { %v2182_v42 = vpack.c.bf16 %v2128_v32, %v2125_v2 }
 0x6b0   : > { %3240 = vmatprep.mubr.bf16.mxu1 %v2182_v42 }
 0x6b1   : > { %3241 = vmatmul.mubr.bf16.gmra.mrb[40].mxu1 %v2183_v12 }
 0x6b2   : > { %v3198_v4 = vpop.f32.mrb[56].mxu0 }
 0x6b3   : > { %v2141_v35 = vpop.f32.mrb[57].mxu0 }
 0x6b4   : > { %v3199_v34 = vpop.f32.mrb[58].mxu0 }
 0x6b5   : > { %v2185_v33 = vpack.c.bf16 %v3199_v34, %v3198_v4  ;;  %v2144_v62 = vpop.f32.mrb[59].mxu0 }
 0x6b6   : > { %v2184_v1 = vpack.c.bf16 %v2144_v62, %v2141_v35 }
 0x6b8   : > { %3244 = vmatprep.mubr.bf16.mxu1 %v2184_v1 }
 0x6b9   : > { %3245 = vmatmul.mubr.bf16.gmra.mrb[44].mxu1 %v2185_v33 }
 0x6ba   : > { %v3202_v46 = vpop.f32.mrb[60].mxu0 }
 0x6bb   : > { %v2157_v27 = vpop.f32.mrb[61].mxu0 }
 0x6bc   : > { %v3203_v14 = vpop.f32.mrb[62].mxu0 }
 0x6bd   : > { %v2187_v37 = vpack.c.bf16 %v3203_v14, %v3202_v46  ;;  %v2160_v38 = vpop.f32.mrb[63].mxu0 }
 0x6be   : > { %v2186_v40 = vpack.c.bf16 %v2160_v38, %v2157_v27 }
 0x6c0   : > { %3248 = vmatprep.mubr.bf16.mxu1 %v2186_v40 }
 0x6c1   : > { %3249 = vmatmul.mubr.bf16.gmra.mrb[48].mxu1 %v2187_v37 }
 0x6c2   : > { %3977 = shalt.err (!%p3974_p8)
}
 0x6c3   : > { %s3978_s6 = scalar_lea.hbm %s5197_s25, 4096  ;;  %s3982_s4 = scalar_lea.hbm %s5487_s10, 16384 }
 0x6c4   : > { %p3979_p10 = scmp.ne.s32.totalorder %s5197_s25, %s3978_s6  ;;  %p3983_p12 = scmp.lt.u32.totalorder %s5197_s25, %s5487_s10 }
 0x6c5   : > { %p3984_p6 = scmp.lt.u32.totalorder %s3982_s4, %s3978_s6  ;;  %p3986_p13 = scmp.lt.u32.totalorder %s3978_s6, %s5197_s25 }
 0x6c6   : > { %p3980_p4 = pnand %p3979_p10, %p5488_p7 }
 0x6c7   : > { %p3985_p3 = por %p3984_p6, %p3983_p12 }
 0x6c8   : > { %p3981_p9 = pneg %p3980_p4 }
 0x6c9   : > { %p3987_p1 = por %p3986_p13, %p3985_p3 }
 0x6cb   : > { %p3988_p11 = pnand %p3987_p1, %p3981_p9 }
 0x6cd   : > { %3991 = shalt.err (!%p3988_p11)
}
 0x6ce   : > { %s4154_s26 = smov 128   ;;  %s4155_s11 = smov 8   ;;  %v5229_v53 = vld [vmem:[#allocation21] ss:$0 sm:$0xff] }
 0x6cf   : > { %3307 = dma.vmem_to_hbm [thread:$0]  (%p5488_p7), %s5200_s12, 4096, %s5197_s25, %s2490_s27, %s4154_s26, %s4154_s26, %s4155_s11  }
 0x6d0   : > { %s2505_s21 = sshll.u32 %s4718_s17, 4  ;;  %s5489_s27 = sld [smem:[#allocation53_spill]]  ;;  %s5301_s21 = int_to_ptr.vmem [resolvable:$true] %s2505_s21 }
 0x6d1   : > { %s2485_s20 = scalar_lea.sflag [#allocation6], %s4681_s18  ;;  %s3992_s3 = scalar_lea.vmem %s5301_s21, 4096 }
 0x6d2   : > { %p3993_p5 = scmp.ne.s32.totalorder %s5301_s21, %s3992_s3  ;;  %s4156_s6 = smov [#allocation22]  }
 0x6d3   : > { %s3996_s19 = sshll.u32 %s4156_s6, 4  ;;  %s3997_s19 = int_to_ptr.vmem [resolvable:$false] %s3996_s19 }
 0x6d4   : > { %p3994_p2 = pnand %p3993_p5, %p5488_p7  ;;  %s3998_s5 = scalar_lea.vmem %s3997_s19, 8192 }
 0x6d5   : > { %p3999_p8 = scmp.lt.s32.totalorder %s5301_s21, %s3997_s19  ;;  %p4000_p10 = scmp.lt.s32.totalorder %s3998_s5, %s3992_s3 }
 0x6d6   : > { %s5490_s8 = smov %s5489_s27  ;;  %s5299_s29 = scalar_lea.hbm %s5489_s27, %s2896_s0 }
 0x6d7   : > { %p3995_p0 = pneg %p3994_p2  ;;  %p4001_p4 = por %p4000_p10, %p3999_p8 }
 0x6d9   : > { %p4002_p9 = pnand %p4001_p4, %p3995_p0 }
 0x75c   : > { %v3222_v39 = vpop.f32.mrb[64].mxu0 }
 0x75d   : > { %v2302_v61 = vadd.f32 %v3222_v39, %v5229_v53  ;;  %v2293_v52 = vpop.f32.mrb[65].mxu0 }
 0x75e   : > { %v2294_v17 = vadd.f32 %v5229_v53, %v2293_v52  ;;  %v3223_v41 = vpop.f32.mrb[66].mxu0 }
 0x75f   : > { %2422 = vst [vmem:[%s4718_s17 + $0x10] sm:$0xff] %v2302_v61  ;;  %v2305_v7 = vadd.f32 %v3223_v41, %v5229_v53  ;;  %v2296_v8 = vpop.f32.mrb[67].mxu0 }
 0x760   : > { %2420 = vst [vmem:[%s4718_s17] sm:$0xff] %v2294_v17  ;;  %v2297_v43 = vadd.f32 %v5229_v53, %v2296_v8 }
 0x761   : > { %2423 = vst [vmem:[%s4718_s17 + $0x18] sm:$0xff] %v2305_v7 }
 0x762   : > { %2421 = vst [vmem:[%s4718_s17 + $0x8] sm:$0xff] %v2297_v43 }
 0x764   : > { %v3226_v55 = vpop.f32.mrb[68].mxu0 }
 0x765   : > { %v2318_v25 = vadd.f32 %v3226_v55, %v5229_v53  ;;  %v2309_v45 = vpop.f32.mrb[69].mxu0 }
 0x766   : > { %v2310_v24 = vadd.f32 %v5229_v53, %v2309_v45  ;;  %v3227_v6 = vpop.f32.mrb[70].mxu0 }
 0x767   : > { %2426 = vst [vmem:[%s4718_s17 + $0x30] sm:$0xff] %v2318_v25  ;;  %v2321_v19 = vadd.f32 %v3227_v6, %v5229_v53  ;;  %v2312_v20 = vpop.f32.mrb[71].mxu0 }
 0x768   : > { %2424 = vst [vmem:[%s4718_s17 + $0x20] sm:$0xff] %v2310_v24  ;;  %v2313_v44 = vadd.f32 %v5229_v53, %v2312_v20 }
 0x769   : > { %2427 = vst [vmem:[%s4718_s17 + $0x38] sm:$0xff] %v2321_v19 }
 0x76a   : > { %2425 = vst [vmem:[%s4718_s17 + $0x28] sm:$0xff] %v2313_v44 }
 0x76c   : > { %v3230_v60 = vpop.f32.mrb[72].mxu0 }
 0x76d   : > { %v2334_v3 = vadd.f32 %v3230_v60, %v5229_v53  ;;  %v2325_v16 = vpop.f32.mrb[73].mxu0 }
 0x76e   : > { %v2326_v22 = vadd.f32 %v5229_v53, %v2325_v16  ;;  %v3231_v50 = vpop.f32.mrb[74].mxu0 }
 0x76f   : > { %2430 = vst [vmem:[%s4718_s17 + $0x50] sm:$0xff] %v2334_v3  ;;  %v2337_v49 = vadd.f32 %v3231_v50, %v5229_v53  ;;  %v2328_v0 = vpop.f32.mrb[75].mxu0 }
 0x770   : > { %2428 = vst [vmem:[%s4718_s17 + $0x40] sm:$0xff] %v2326_v22  ;;  %v2329_v10 = vadd.f32 %v5229_v53, %v2328_v0 }
 0x771   : > { %2431 = vst [vmem:[%s4718_s17 + $0x58] sm:$0xff] %v2337_v49 }
 0x772   : > { %2429 = vst [vmem:[%s4718_s17 + $0x48] sm:$0xff] %v2329_v10 }
 0x774   : > { %v3234_v5 = vpop.f32.mrb[32].mxu1 }
 0x775   : > { %v2350_v51 = vadd.f32 %v3234_v5, %v5229_v53  ;;  %v2341_v47 = vpop.f32.mrb[33].mxu1 }
 0x776   : > { %v2342_v18 = vadd.f32 %v5229_v53, %v2341_v47  ;;  %v3235_v58 = vpop.f32.mrb[34].mxu1 }
 0x777   : > { %2434 = vst [vmem:[%s4718_s17 + $0x70] sm:$0xff] %v2350_v51  ;;  %v2353_v56 = vadd.f32 %v3235_v58, %v5229_v53  ;;  %v2344_v30 = vpop.f32.mrb[35].mxu1 }
 0x778   : > { %2432 = vst [vmem:[%s4718_s17 + $0x60] sm:$0xff] %v2342_v18  ;;  %v2345_v48 = vadd.f32 %v5229_v53, %v2344_v30 }
 0x779   : > { %2435 = vst [vmem:[%s4718_s17 + $0x78] sm:$0xff] %v2353_v56 }
 0x77a   : > { %2433 = vst [vmem:[%s4718_s17 + $0x68] sm:$0xff] %v2345_v48 }
 0x77c   : > { %v3238_v9 = vpop.f32.mrb[36].mxu1 }
 0x77d   : > { %v2366_v57 = vadd.f32 %v3238_v9, %v5229_v53  ;;  %v2357_v59 = vpop.f32.mrb[37].mxu1 }
 0x77e   : > { %v2358_v29 = vadd.f32 %v5229_v53, %v2357_v59  ;;  %v3239_v13 = vpop.f32.mrb[38].mxu1 }
 0x77f   : > { %2438 = vst [vmem:[%s4718_s17 + $0x90] sm:$0xff] %v2366_v57  ;;  %v2369_v15 = vadd.f32 %v3239_v13, %v5229_v53  ;;  %v2360_v21 = vpop.f32.mrb[39].mxu1 }
 0x780   : > { %2436 = vst [vmem:[%s4718_s17 + $0x80] sm:$0xff] %v2358_v29  ;;  %v2361_v11 = vadd.f32 %v5229_v53, %v2360_v21 }
 0x781   : > { %2439 = vst [vmem:[%s4718_s17 + $0x98] sm:$0xff] %v2369_v15 }
 0x782   : > { %2437 = vst [vmem:[%s4718_s17 + $0x88] sm:$0xff] %v2361_v11 }
 0x784   : > { %v3242_v54 = vpop.f32.mrb[40].mxu1 }
 0x785   : > { %v2382_v23 = vadd.f32 %v3242_v54, %v5229_v53  ;;  %v2373_v28 = vpop.f32.mrb[41].mxu1 }
 0x786   : > { %v2374_v36 = vadd.f32 %v5229_v53, %v2373_v28  ;;  %v3243_v63 = vpop.f32.mrb[42].mxu1 }
 0x787   : > { %2442 = vst [vmem:[%s4718_s17 + $0xb0] sm:$0xff] %v2382_v23  ;;  %v2385_v26 = vadd.f32 %v3243_v63, %v5229_v53  ;;  %v2376_v2 = vpop.f32.mrb[43].mxu1 }
 0x788   : > { %2440 = vst [vmem:[%s4718_s17 + $0xa0] sm:$0xff] %v2374_v36  ;;  %v2377_v31 = vadd.f32 %v5229_v53, %v2376_v2 }
 0x789   : > { %2443 = vst [vmem:[%s4718_s17 + $0xb8] sm:$0xff] %v2385_v26 }
 0x78a   : > { %2441 = vst [vmem:[%s4718_s17 + $0xa8] sm:$0xff] %v2377_v31 }
 0x78c   : > { %v3246_v12 = vpop.f32.mrb[44].mxu1 }
 0x78d   : > { %v2398_v32 = vadd.f32 %v3246_v12, %v5229_v53  ;;  %v2389_v42 = vpop.f32.mrb[45].mxu1 }
 0x78e   : > { %v2390_v4 = vadd.f32 %v5229_v53, %v2389_v42  ;;  %v3247_v35 = vpop.f32.mrb[46].mxu1 }
 0x78f   : > { %2446 = vst [vmem:[%s4718_s17 + $0xd0] sm:$0xff] %v2398_v32  ;;  %v2401_v34 = vadd.f32 %v3247_v35, %v5229_v53  ;;  %v2392_v33 = vpop.f32.mrb[47].mxu1 }
 0x790   : > { %2444 = vst [vmem:[%s4718_s17 + $0xc0] sm:$0xff] %v2390_v4  ;;  %v2393_v62 = vadd.f32 %v5229_v53, %v2392_v33 }
 0x791   : > { %2447 = vst [vmem:[%s4718_s17 + $0xd8] sm:$0xff] %v2401_v34 }
 0x792   : > { %2445 = vst [vmem:[%s4718_s17 + $0xc8] sm:$0xff] %v2393_v62 }
 0x794   : > { %v3250_v1 = vpop.f32.mrb[48].mxu1 }
 0x795   : > { %v2414_v46 = vadd.f32 %v3250_v1, %v5229_v53  ;;  %v2405_v27 = vpop.f32.mrb[49].mxu1 }
 0x796   : > { %v2406_v14 = vadd.f32 %v5229_v53, %v2405_v27  ;;  %v3251_v37 = vpop.f32.mrb[50].mxu1 }
 0x797   : > { %2450 = vst [vmem:[%s4718_s17 + $0xf0] sm:$0xff] %v2414_v46  ;;  %v2417_v38 = vadd.f32 %v3251_v37, %v5229_v53  ;;  %v2408_v40 = vpop.f32.mrb[51].mxu1 }
 0x798   : > { %2448 = vst [vmem:[%s4718_s17 + $0xe0] sm:$0xff] %v2406_v14  ;;  %v2409_v39 = vadd.f32 %v5229_v53, %v2408_v40 }
 0x799   : > { %2451 = vst [vmem:[%s4718_s17 + $0xf8] sm:$0xff] %v2417_v38 }
 0x79a   : > { %2449 = vst [vmem:[%s4718_s17 + $0xe8] sm:$0xff] %v2409_v39 }
 0x79b   : > { %4005 = shalt.err (!%p4002_p9)
}
 0x79c   : > { %s4006_s17 = scalar_lea.hbm %s5299_s29, 4096  ;;  %s4010_s4 = scalar_lea.hbm %s5490_s8, 16384 }
 0x79d   : > { %p4007_p12 = scmp.ne.s32.totalorder %s5299_s29, %s4006_s17  ;;  %p4011_p13 = scmp.lt.u32.totalorder %s5299_s29, %s5490_s8 }
 0x79e   : > { %p4012_p1 = scmp.lt.u32.totalorder %s4010_s4, %s4006_s17  ;;  %p4014_p5 = scmp.lt.u32.totalorder %s4006_s17, %s5299_s29 }
 0x79f   : > { %p4008_p6 = pnand %p4007_p12, %p5488_p7 }
 0x7a0   : > { %p4013_p11 = por %p4012_p1, %p4011_p13 }
 0x7a1   : > { %p4009_p3 = pneg %p4008_p6 }
 0x7a2   : > { %p4015_p2 = por %p4014_p5, %p4013_p11 }
 0x7a4   : > { %p4016_p0 = pnand %p4015_p2, %p4009_p3 }
 0x7a6   : > { %4019 = shalt.err (!%p4016_p0)
}
 0x7a7   : > { %3306 = dma.vmem_to_hbm [thread:$0]  (%p5488_p7), %s5301_s21, 4096, %s5299_s29, %s2485_s20, %s4154_s26, %s4154_s26, %s4155_s11  }
 0x7a8 PF: > { %s5491_s25 = sld [smem:[#allocation34_spill]]  ;;  %p3369_p8 = scmp.ge.s32.totalorder %s4138_s13, 2 }
 0x7a9   : > { %p5492_p10 = scmp.ne.s32.totalorder %s5461_s15, 0 }
 0x7ab   : > { %p3346_p4 = pnand %p3369_p8, %p5492_p10 }
 0x7ae   : > { %s2538_s12 = sand.u32 1, %s5491_s25  }
 0x7af   : > { %s2539_s27 = scalar_lea.sflag [#allocation6], %s2538_s12 }
 0x7b0   : > { %4089 = dma.done.wait (!%p3346_p4), %s2539_s27, 4096  }
 0x7b1   : > { %4091 = vsyncadd (!%p3346_p4), %s2539_s27, 4294963200  ;;  %s2548_s7 = scalar_lea.sflag [#allocation24], %s2538_s12 }
 0x7b2   : > { %4093 = dma.done.wait (!%p3346_p4), %s2548_s7, 4096  }
 0x7b3   : > { %4095 = vsyncadd (!%p3346_p4), %s2548_s7, 4294963200  ;;  %s39_s13 = sadd.s32 1, %s4138_s13   ;;  %s5493_s21 = sld [smem:[#allocation33_spill]] }
 0x7b4   : > { %p36_p9 = scmp.ge.s32.totalorder %s39_s13, 6   ;;  %s5494_s24 = sld [smem:[#allocation35_spill]] }
 0x7b5   : > { %s5495_s25 = sld [smem:[#allocation36_spill]]  ;;  %s5496_s18 = smov %s5511_s22 }
 0x7b6   : > { %s5497_s27 = sld [smem:[#allocation39_spill]]  ;;  %s5498_s29 = sld [smem:[#allocation42_spill]] }
 0x7b7   : > { %s5499_s22 = smov %s4106_s23  ;;  %s5500_s23 = smov %s4595_s28 }
 0x7b8   : > { %s5501_s26 = smov %s5496_s18  ;;  %s5502_s28 = smov %s4134_s30 }
 0x7b9   : > { %s5503_s30 = smov %s5509_s16  ;;  %38 = sbr.rel (!%p36_p9) target bundleno = 30 (0x1e), region = 186 }
 0x7c0   :  { %2553 = vsyncpa [#allocation5], 1 }
 0x7c1   :  { %2555 = vsyncpa [#allocation5 + $0x1], 1 }
 0x7c2   :  { %2556 = vsyncpa [#allocation8], 1 }
 0x7c3   :  { %2558 = vsyncpa [#allocation8 + $0x1], 1 }
 0x7c4   :  { %2559 = vsyncpa [#allocation11], 1 }
 0x7c5   :  { %2560 = vsyncpa [#allocation14], 1 }
 0x7c6   :  { %2561 = vsyncpa [#allocation17], 1 }
 0x7c7   :  { %2562 = vsyncpa [#allocation20], 1 }
 0x7c8   :  { %2563 = vsyncpa [#allocation6], 1 }
 0x7c9   :  { %2565 = vsyncpa [#allocation6 + $0x1], 1 }
 0x7ca   :  { %2566 = vsyncpa [#allocation24], 1 }
 0x7cb   :  { %2568 = vsyncpa [#allocation24 + $0x1], 1 }

</bundles_post_ra>
